<compile_context>
chip_gen: v7x
topology: tpu7x:2x2x1
jax: 0.10.0
libtpu: 0.0.40
codegen_flags: <defaults>
</compile_context>

<pallas_src>
import math
import functools

import jax
import jax.numpy as jnp
from jax.experimental import pallas as pl
from jax.experimental.pallas import tpu as pltpu


def _round_up(x: int, m: int) -> int:
    return ((x + m - 1) // m) * m


def make_sinusoidal_pe(num_time_bins: int, embed_dim: int) -> jnp.ndarray:
    """Same construction as the PyTorch __init__ (non-learned branch)."""
    position = jnp.arange(num_time_bins, dtype=jnp.float32)[:, None]           # [NB, 1]
    div_term = jnp.exp(jnp.arange(0, embed_dim, 2, dtype=jnp.float32)
                       * (-math.log(10000.0) / embed_dim))                     # [D/2]
    pe = jnp.zeros((num_time_bins, embed_dim), dtype=jnp.float32)
    pe = pe.at[:, 0::2].set(jnp.sin(position * div_term))
    pe = pe.at[:, 1::2].set(jnp.cos(position * div_term))
    return pe


def _make_banded_pe(pe: jnp.ndarray, pack: int) -> jnp.ndarray:
    """[pack, NB, pack*D] table: band j carries pe in columns [j*D, (j+1)*D), zeros elsewhere.

    Trace-time constant-sized (pack*NB*128*4 B ~= 200 KiB for NB=100); built once per call
    (hoist/cache it in real model code).
    """
    nb, d = pe.shape
    banded = jnp.zeros((pack, nb, pack * d), dtype=jnp.float32)
    for j in range(pack):
        banded = banded.at[j, :, j * d:(j + 1) * d].set(pe.astype(jnp.float32))
    return banded


def _temporal_pe_packed_kernel(td_ref, pe_ref, out_ref, *,
                               max_time_diff: float, num_time_bins: int, pack: int):
    # td_ref:  [rows, pack]          f32   rows = tile_b // pack ; row r holds original rows
    #                                      pack*r .. pack*r+pack-1 of this batch tile
    # pe_ref:  [pack, NB, pack*D]    f32   banded pe table, VMEM-resident across grid steps
    # out_ref: [rows, pack*D(=128)]  f32   lane-dense packed output tile
    nb = num_time_bins
    rows = td_ref.shape[0]

    tdc = jnp.clip(td_ref[...], 0.0, max_time_diff)                          # [rows, pack]
    # Closed-form bucketize: bins[k] = k*max/(NB-1)  =>  #{bins < td} == ceil(td*(NB-1)/max).
    scale = float(nb - 1) / float(max_time_diff)
    idx = jnp.clip(jnp.ceil(tdc * scale), 0.0, float(nb - 1)).astype(jnp.int32)  # [rows, pack]

    # Row gather via one-hot matmuls on the MXU; band j writes columns [j*D,(j+1)*D) of the
    # packed output (exact: 1.0*pe_row + 0.0*rest accumulated in f32).
    iota_nb = jax.lax.broadcasted_iota(jnp.int32, (rows, nb), 1)             # [rows, NB]
    acc = None
    for j in range(pack):                                                    # static, unrolled
        onehot_j = (iota_nb == idx[:, j:j + 1]).astype(jnp.float32)          # [rows, NB]
        part = jnp.dot(onehot_j, pe_ref[j], preferred_element_type=jnp.float32)  # [rows, 128]
        acc = part if acc is None else acc + part
    out_ref[...] = acc.astype(out_ref.dtype)


def temporal_positional_encoding(time_diff: jnp.ndarray,
                                 pe: jnp.ndarray,
                                 max_time_diff: float,
                                 *,
                                 tile_b: int = 4096,
                                 min_pallas_batch: int = 8192) -> jnp.ndarray:
    """Pallas wrapper. time_diff: [B] or [B, 1]. Returns [B, embed_dim] float32."""
    if time_diff.ndim == 2 and time_diff.shape[1] == 1:
        time_diff = time_diff[:, 0]
    B = time_diff.shape[0]
    num_time_bins, embed_dim = pe.shape
    td = time_diff.astype(jnp.float32)
    pe = pe.astype(jnp.float32)

    # Degenerate hyperparameters: every input maps to pe[0] (avoids divide-by-zero in the
    # closed-form bucketize scale).
    if num_time_bins == 1 or float(max_time_diff) <= 0.0:
        return jnp.broadcast_to(pe[0], (B, embed_dim)).astype(jnp.float32)

    # How many original rows pack into one 128-lane output row.
    pack = 128 // embed_dim if (embed_dim <= 128 and 128 % embed_dim == 0) else 1

    if B < min_pallas_batch or pack == 1:
        # Per row this op moves ~4 B in / ~4*D B out; below ~8K-32K rows the pallas_call launch
        # plus per-grid-step fixed cost dominates, so the XLA-fused gather is as fast or faster
        # (and fuses with neighbors).  Also the generic fallback for embed dims that don't pack
        # into 128 lanes.
        # TODO(synk): add a natural-layout Pallas path for embed_dim not dividing 128.
        bins = jnp.linspace(0.0, max_time_diff, num_time_bins)
        tdc = jnp.clip(td, 0.0, max_time_diff)
        idx = jnp.clip(jnp.searchsorted(bins, tdc, side='left'), 0, num_time_bins - 1)
        return pe[idx]

    # ---- tile sizing -------------------------------------------------------------------
    # Blocks: td (tile//pack, pack), out (tile//pack, 128) -> tile must be a multiple of 8*pack.
    # Default 4096-row tiles amortize the ~0.35 us per-step cost; per-step VMEM (double-buffered
    # td + out + resident banded pe + onehot temporaries) stays ~3-4 MiB — comfortable under the
    # scoped-VMEM defaults of v5e (16 MiB) and v6e/v7x (32 MiB; v7x has 64 MiB physical).
    row_align = 8 * pack
    max_tile = max(row_align, (int(tile_b) // row_align) * row_align)
    if B <= max_tile and B > 2 * row_align:
        # Keep >= 2 grid steps so v7x can shard the batch across its 2 TensorCores.
        max_tile = _round_up(pl.cdiv(B, 2), row_align)
    tile = min(max_tile, _round_up(B, row_align))
    num_tiles = pl.cdiv(B, tile)
    tile = _round_up(pl.cdiv(B, num_tiles), row_align)   # trim padded rows in the last tile
    pB = num_tiles * tile

    # Free row-major reshape: element (r, j) of td_g is original row pack*r + j.  Padded rows
    # (td = 0) produce pe[0] and are sliced off below.
    td_g = jnp.pad(td, (0, pB - B)).reshape(pB // pack, pack)
    pe_banded = _make_banded_pe(pe, pack)                # [pack, NB, 128]

    kernel = functools.partial(_temporal_pe_packed_kernel,
                               max_time_diff=float(max_time_diff),
                               num_time_bins=int(num_time_bins),
                               pack=int(pack))

    out_packed = pl.pallas_call(
        kernel,
        out_shape=jax.ShapeDtypeStruct((pB // pack, pack * embed_dim), jnp.float32),
        grid_spec=pltpu.PrefetchScalarGridSpec(
            num_scalar_prefetch=0,
            grid=(num_tiles,),
            in_specs=[
                # batch tile of grouped time diffs
                pl.BlockSpec((tile // pack, pack), lambda i: (i, 0)),
                # banded pe table, VMEM-resident across all grid steps (constant index_map)
                pl.BlockSpec((pack, num_time_bins, pack * embed_dim), lambda i: (0, 0, 0)),
            ],
            out_specs=pl.BlockSpec((tile // pack, pack * embed_dim), lambda i: (i, 0)),
        ),
        compiler_params=pltpu.CompilerParams(
            dimension_semantics=("parallel",),   # shard batch steps across TCs on v7x
        ),
    )(td_g, pe_banded)

    # (pB//pack, 128) -> (pB, D) is a bit-identical row-major reshape (free), then drop padding.
    return out_packed.reshape(pB, embed_dim)[:B]


def _reference(time_diff, pe, time_bin_values, max_time_diff):
    """Pure-JAX reference mirroring the PyTorch forward."""
    if time_diff.ndim == 2 and time_diff.shape[1] == 1:
        time_diff = time_diff[:, 0]
    td = jnp.clip(time_diff, 0.0, max_time_diff)
    idx = jnp.searchsorted(time_bin_values, td, side='left')   # == torch.bucketize(right=False)
    idx = jnp.clip(idx, 0, pe.shape[0] - 1)
    return pe[idx]


if __name__ == "__main__":
    # Module hyperparameters (deterministic, in-script)
    embed_dim = 32
    max_time_diff = 10.0
    num_time_bins = 100

    pe = make_sinusoidal_pe(num_time_bins, embed_dim)
    time_bin_values = jnp.linspace(0.0, max_time_diff, num_time_bins)

    # Example input: time differences [batch, 1].  Values lie on a 0.01 grid in [-2, 12] so they
    # never land within fp rounding distance of an interior bin boundary (where closed-form
    # bucketize vs searchsorted could legitimately differ by one bin); exact 0.0 / 10.0
    # endpoints (via clamping) are included.
    key = jax.random.PRNGKey(0)
    batch = 2000   # non-multiple of the tile size -> exercises padding + a 2-step grid
    time_diff = (jax.random.randint(key, (batch, 1), 0, 1401).astype(jnp.float32)
                 / 100.0) - 2.0

    # min_pallas_batch=0 forces the Pallas path for this small demo batch; the production
    # default (8192) routes small batches to the XLA-fused gather where it is faster.
    out = temporal_positional_encoding(time_diff, pe, max_time_diff, min_pallas_batch=0)
    out = jax.block_until_ready(out)

    ref = _reference(time_diff, pe, time_bin_values, max_time_diff)
    assert out.shape == (batch, embed_dim)
    assert jnp.allclose(out, ref, atol=1e-6), "mismatch vs reference"

    print("KERNEL_OK")
</pallas_src>

<mosaic_0001>
module attributes {stable_mosaic.version = 11 : i64} {
  func.func @_temporal_pe_packed_kernel(%arg0: i32, %arg1: memref<256x4xf32, #tpu.memory_space<vmem>>, %arg2: memref<4x100x128xf32, #tpu.memory_space<vmem>>, %arg3: memref<256x128xf32, #tpu.memory_space<vmem>>) attributes {dimension_semantics = [#tpu.dimension_semantics<parallel>], iteration_bounds = array<i64: 2>, scalar_prefetch = 0 : i64, scratch_operands = 0 : i64, tpu.core_type = #tpu.core_type<tc>, window_params = [{transform_indices = @transform_0, window_bounds = array<i64: 256, 4>}, {pipeline_mode = #tpu.pipeline_mode<synchronous>, transform_indices = @transform_1, window_bounds = array<i64: 4, 100, 128>}, {transform_indices = @transform_2, window_bounds = array<i64: 256, 128>}]} {
    %c0 = arith.constant 0 : index
    %c0_0 = arith.constant 0 : index
    %0 = vector.load %arg1[%c0, %c0_0] : memref<256x4xf32, #tpu.memory_space<vmem>>, vector<256x4xf32>
    %cst = arith.constant 0.000000e+00 : f32
    %cst_1 = arith.constant 1.000000e+01 : f32
    %1 = vector.broadcast %cst : f32 to vector<256x4xf32>
    %2 = arith.maximumf %1, %0 : vector<256x4xf32>
    %3 = vector.broadcast %cst_1 : f32 to vector<256x4xf32>
    %4 = arith.minimumf %3, %2 : vector<256x4xf32>
    %cst_2 = arith.constant 9.89999961 : f32
    %5 = vector.broadcast %cst_2 : f32 to vector<256x4xf32>
    %6 = arith.mulf %4, %5 : vector<256x4xf32>
    %7 = math.ceil %6 : vector<256x4xf32>
    %cst_3 = arith.constant 0.000000e+00 : f32
    %cst_4 = arith.constant 9.900000e+01 : f32
    %8 = vector.broadcast %cst_3 : f32 to vector<256x4xf32>
    %9 = arith.maximumf %8, %7 : vector<256x4xf32>
    %10 = vector.broadcast %cst_4 : f32 to vector<256x4xf32>
    %11 = arith.minimumf %10, %9 : vector<256x4xf32>
    %12 = arith.fptosi %11 : vector<256x4xf32> to vector<256x4xi32>
    %13 = tpu.iota {dimensions = array<i32: 1>} : vector<256x100xi32>
    %14 = vector.extract_strided_slice %12 {offsets = [0, 0], sizes = [256, 1], strides = [1, 1]} : vector<256x4xi32> to vector<256x1xi32>
    %15 = vector.broadcast %14 : vector<256x1xi32> to vector<256x100xi32>
    %16 = arith.cmpi eq, %13, %15 : vector<256x100xi32>
    %17 = arith.extui %16 : vector<256x100xi1> to vector<256x100xi32>
    %18 = arith.sitofp %17 : vector<256x100xi32> to vector<256x100xf32>
    %c0_5 = arith.constant 0 : index
    %c0_6 = arith.constant 0 : index
    %c0_7 = arith.constant 0 : index
    %19 = vector.load %arg2[%c0_5, %c0_6, %c0_7] : memref<4x100x128xf32, #tpu.memory_space<vmem>>, vector<1x100x128xf32>
    %20 = vector.shape_cast %19 : vector<1x100x128xf32> to vector<100x128xf32>
    %cst_8 = arith.constant dense<0.000000e+00> : vector<256x128xf32>
    %21 = tpu.matmul %18, %20, %cst_8 {dimension_numbers = #tpu.dot_dimension_numbers<[1], [0], [0], [1], [0, 0, 1, 1], [], []>} : vector<256x100xf32>, vector<100x128xf32>, vector<256x128xf32> -> vector<256x128xf32>
    %22 = vector.extract_strided_slice %12 {offsets = [0, 1], sizes = [256, 1], strides = [1, 1]} : vector<256x4xi32> to vector<256x1xi32>
    %23 = vector.broadcast %22 : vector<256x1xi32> to vector<256x100xi32>
    %24 = arith.cmpi eq, %13, %23 : vector<256x100xi32>
    %25 = arith.extui %24 : vector<256x100xi1> to vector<256x100xi32>
    %26 = arith.sitofp %25 : vector<256x100xi32> to vector<256x100xf32>
    %c1 = arith.constant 1 : index
    %c0_9 = arith.constant 0 : index
    %c0_10 = arith.constant 0 : index
    %27 = vector.load %arg2[%c1, %c0_9, %c0_10] : memref<4x100x128xf32, #tpu.memory_space<vmem>>, vector<1x100x128xf32>
    %28 = vector.shape_cast %27 : vector<1x100x128xf32> to vector<100x128xf32>
    %cst_11 = arith.constant dense<0.000000e+00> : vector<256x128xf32>
    %29 = tpu.matmul %26, %28, %cst_11 {dimension_numbers = #tpu.dot_dimension_numbers<[1], [0], [0], [1], [0, 0, 1, 1], [], []>} : vector<256x100xf32>, vector<100x128xf32>, vector<256x128xf32> -> vector<256x128xf32>
    %30 = arith.addf %21, %29 : vector<256x128xf32>
    %31 = vector.extract_strided_slice %12 {offsets = [0, 2], sizes = [256, 1], strides = [1, 1]} : vector<256x4xi32> to vector<256x1xi32>
    %32 = vector.broadcast %31 : vector<256x1xi32> to vector<256x100xi32>
    %33 = arith.cmpi eq, %13, %32 : vector<256x100xi32>
    %34 = arith.extui %33 : vector<256x100xi1> to vector<256x100xi32>
    %35 = arith.sitofp %34 : vector<256x100xi32> to vector<256x100xf32>
    %c2 = arith.constant 2 : index
    %c0_12 = arith.constant 0 : index
    %c0_13 = arith.constant 0 : index
    %36 = vector.load %arg2[%c2, %c0_12, %c0_13] : memref<4x100x128xf32, #tpu.memory_space<vmem>>, vector<1x100x128xf32>
    %37 = vector.shape_cast %36 : vector<1x100x128xf32> to vector<100x128xf32>
    %cst_14 = arith.constant dense<0.000000e+00> : vector<256x128xf32>
    %38 = tpu.matmul %35, %37, %cst_14 {dimension_numbers = #tpu.dot_dimension_numbers<[1], [0], [0], [1], [0, 0, 1, 1], [], []>} : vector<256x100xf32>, vector<100x128xf32>, vector<256x128xf32> -> vector<256x128xf32>
    %39 = arith.addf %30, %38 : vector<256x128xf32>
    %40 = vector.extract_strided_slice %12 {offsets = [0, 3], sizes = [256, 1], strides = [1, 1]} : vector<256x4xi32> to vector<256x1xi32>
    %41 = vector.broadcast %40 : vector<256x1xi32> to vector<256x100xi32>
    %42 = arith.cmpi eq, %13, %41 : vector<256x100xi32>
    %43 = arith.extui %42 : vector<256x100xi1> to vector<256x100xi32>
    %44 = arith.sitofp %43 : vector<256x100xi32> to vector<256x100xf32>
    %c3 = arith.constant 3 : index
    %c0_15 = arith.constant 0 : index
    %c0_16 = arith.constant 0 : index
    %45 = vector.load %arg2[%c3, %c0_15, %c0_16] : memref<4x100x128xf32, #tpu.memory_space<vmem>>, vector<1x100x128xf32>
    %46 = vector.shape_cast %45 : vector<1x100x128xf32> to vector<100x128xf32>
    %cst_17 = arith.constant dense<0.000000e+00> : vector<256x128xf32>
    %47 = tpu.matmul %44, %46, %cst_17 {dimension_numbers = #tpu.dot_dimension_numbers<[1], [0], [0], [1], [0, 0, 1, 1], [], []>} : vector<256x100xf32>, vector<100x128xf32>, vector<256x128xf32> -> vector<256x128xf32>
    %48 = arith.addf %39, %47 : vector<256x128xf32>
    %c0_18 = arith.constant 0 : index
    %c0_19 = arith.constant 0 : index
    %49 = vector.load %arg3[%c0_18, %c0_19] : memref<256x128xf32, #tpu.memory_space<vmem>>, vector<256x128xf32>
    tpu.vector_store %arg3[%c0_18, %c0_19], %48 {strides = array<i32>} : memref<256x128xf32, #tpu.memory_space<vmem>>, vector<256x128xf32>,
    return
  }
  func.func @transform_0(%arg0: i32) -> (i32, i32) {
    %c0_i32 = arith.constant 0 : i32
    %c0_i32_0 = arith.constant 0 : i32
    return %arg0, %c0_i32 : i32, i32
  }
  func.func @transform_1(%arg0: i32) -> (i32, i32, i32) {
    %c0_i32 = arith.constant 0 : i32
    %c0_i32_0 = arith.constant 0 : i32
    %c0_i32_1 = arith.constant 0 : i32
    %c0_i32_2 = arith.constant 0 : i32
    return %c0_i32, %c0_i32_0, %c0_i32_1 : i32, i32, i32
  }
  func.func @transform_2(%arg0: i32) -> (i32, i32) {
    %c0_i32 = arith.constant 0 : i32
    %c0_i32_0 = arith.constant 0 : i32
    return %arg0, %c0_i32 : i32, i32
  }
}

</mosaic_0001>

<bundles_post_ra>
// kernel: tpu_custom_call.1
= control target key start
LH: loop header
LB: loop body
LE: loop exit
PB: predicated region body
PF: predicated region fallthrough
CT: control target
= control target key end

     0   :  { %7 = vsyncpa [#allocation3], 0  ;;  %s5001_s0 = inlined_call_operand.vmem [shape: f32[512,4], index: 0, kind: input, shape index: {}]   ;;  %s5002_s1 = inlined_call_operand.vmem [shape: f32[4,100,128], index: 1, kind: input, shape index: {}]   ;;  %s5003_s2 = inlined_call_operand.hbm [shape: f32[512,128], index: 2, kind: output, shape index: {}]  }
   0x1   :  { %9 = vsyncpa [#allocation3 + $0x1], 0  ;;  %s3903_s9 = smov 0   ;;  %s3905_s10 = smov 0  }
   0x2   :  { %s3907_s11 = smov 0   ;;  %s3909_s12 = smov 0  }
   0x3 LB: > { %s3924_s13 = sadd.s32 4294967295, %s3878_s12   ;;  %s2696_s14 = sadd.s32 4294967294, %s3878_s12   ;;  %s3878_s12 = sphi %s3909_s12, %s5020_s12   ;;  %s3874_s11 = sphi %s3907_s11, %s5019_s11   ;;  %s3870_s10 = sphi %s3905_s10, %s5018_s10   ;;  %s3866_s9 = sphi %s3903_s9, %s5017_s9  }
   0x4   : > { %s3928_s15 = sadd.s32 1, %s3878_s12   ;;  %s69_s16 = sadd.s32 1, %s3874_s11 }
   0x5   : > { %s66_s17 = ssub.s32 %s3878_s12, %s3928_s15  ;;  %p79_p0 = scmp.ne.s32.totalorder %s3874_s11, %s3870_s10 }
   0x6   : > { %p67_p1 = scmp.eq.s32.totalorder %s66_s17, 0  ;;  %p80_p2 = scmp.eq.s32.totalorder %s3924_s13, 1 }
   0x7   : > { %p85_p3 = scmp.ne.s32.totalorder %s3870_s10, %s3866_s9  ;;  %p86_p4 = scmp.eq.s32.totalorder %s2696_s14, 1 }
   0x8   : > { %s3939_s18 = scalar_select %p67_p1, %s3874_s11, %s69_s16  }
   0x9   : > { %p3941_p5 = por %p80_p2, %p79_p0  ;;  %p3945_p6 = por %p86_p4, %p85_p3 }
   0xa   : > { %p2699_p7 = scmp.ge.s32.totalorder %s3878_s12, 1  ;;  %p116_p8 = scmp.lt.s32.totalorder %s3878_s12, 3 }
   0xc   : > { %p117_p9 = pnand %p2699_p7, %p116_p8 }
   0xe   : > { %120 = sbr.rel (%p117_p9) target bundleno = 724 (0x2d4), region = 28 }
  0x15   : > { %s2701_s21 = sshll.u32 %s3924_s13, 5  ;;  %v5004_v0 = vmov 0   ;;  %vm911_vm0 = vcmask 1043456   ;;  %vm814_vm1 = vcmask 818176   ;;  %s135_s14 = sand.u32 1, %s3870_s10  }
  0x16   : > { %3787 = vset.pattern.permute.xlu1 %v5004_v0  ;;  %3786 = vset.pattern.permute.xlu0 %v5004_v0  ;;  %p139_p10 = scmp.lt.s32.totalorder %s2701_s21, 63  ;;  %v2956_v0 = vld [vmem:[%s5002_s1 + $0x138] sm:$0xff]  ;;  %s2700_s16 = sshll.u32 %s135_s14, 8 }
  0x17   : > { %s4915_s17 = scalar_lea.vmem [#allocation2], %s2700_s16  ;;  %s4960_s26 = scalar_lea.sflag [#allocation3], %s135_s14 }
  0x18   : > { %s5022_s21 = smov (!%p139_p10, %s2701_s21), 63  ;;  %s3885_s27 = smov [#allocation2]  }
  0x19   : > { %s2702_s22 = sshll.u32 %s5022_s21, 3  ;;  %s3007_s21 = sshll.u32 %s3924_s13, 12 }
  0x1a   : > { %s3957_s25 = scalar_lea.vmem %s5001_s0, %s2702_s22  ;;  %s2634_s22 = sshll.u32 %s4915_s17, 4  ;;  %s4954_s22 = int_to_ptr.vmem [resolvable:$true] %s2634_s22 }
  0x1b   : > { %v147_v1 = vld [vmem:[%s3957_s25 + $0x10] sm:$0xff]  ;;  %v145_v2 = vld [vmem:[%s3957_s25] sm:$0xff]  ;;  %v148_v3 = vld [vmem:[%s3957_s25 + $0x18] sm:$0xff]  ;;  %s4952_s24 = scalar_lea.hbm %s5003_s2, %s3007_s21  ;;  %s3816_s13 = scalar_lea.vmem %s4954_s22, 4096 }
  0x1c   : > { %v179_v4 = vmax.f32 %v147_v1, 0.0  ;;  %v177_v5 = vmax.f32 %v145_v2, 0.0  ;;  %v180_v6 = vmax.f32 %v148_v3, 0.0  ;;  %v146_v7 = vld [vmem:[%s3957_s25 + $0x8] sm:$0xff]  ;;  %v149_v9 = vld [vmem:[%s3957_s25 + $0x20] sm:$0xff]  ;;  %v152_v13 = vld [vmem:[%s3957_s25 + $0x38] sm:$0xff]  ;;  %p3817_p11 = scmp.ne.s32.totalorder %s4954_s22, %s3816_s13 }
  0x1d   : > { %v150_v8 = vld [vmem:[%s3957_s25 + $0x28] sm:$0xff]  ;;  %v178_v10 = vmax.f32 %v146_v7, 0.0  ;;  %v181_v12 = vmax.f32 %v149_v9, 0.0  ;;  %v151_v14 = vld [vmem:[%s3957_s25 + $0x30] sm:$0xff]  ;;  %v184_v18 = vmax.f32 %v152_v13, 0.0  ;;  %v153_v60 = vld [vmem:[%s3957_s25 + $0x40] sm:$0xff] }
  0x1e   : > { %v182_v11 = vmax.f32 %v150_v8, 0.0  ;;  %v211_v15 = vmin.f32 %v179_v4, 10.0  ;;  %v209_v16 = vmin.f32 %v177_v5, 10.0  ;;  %v212_v17 = vmin.f32 %v180_v6, 10.0  ;;  %v154_v59 = vld [vmem:[%s3957_s25 + $0x48] sm:$0xff]  ;;  %v156_v61 = vld [vmem:[%s3957_s25 + $0x58] sm:$0xff]  ;;  %p3818_p12 = pnand %p3817_p11, %p3941_p5 }
  0x1f   : > { %v210_v19 = vmin.f32 %v178_v10, 10.0  ;;  %v213_v21 = vmin.f32 %v181_v12, 10.0  ;;  %v183_v22 = vmax.f32 %v151_v14, 0.0  ;;  %v216_v32 = vmin.f32 %v184_v18, 10.0  ;;  %v155_v3 = vld [vmem:[%s3957_s25 + $0x50] sm:$0xff]  ;;  %v158_v4 = vld [vmem:[%s3957_s25 + $0x68] sm:$0xff] }
  0x20   : > { %v214_v20 = vmin.f32 %v182_v11, 10.0  ;;  %v243_v23 = vmul.f32 9.9, %v211_v15  ;;  %v241_v24 = vmul.f32 9.9, %v209_v16  ;;  %v157_v5 = vld [vmem:[%s3957_s25 + $0x60] sm:$0xff]  ;;  %p3819_p13 = pneg %p3818_p12 }
  0x21   : > { %v244_v25 = vmul.f32 9.9, %v212_v17  ;;  %v242_v26 = vmul.f32 9.9, %v210_v19  ;;  %v245_v28 = vmul.f32 9.9, %v213_v21 }
  0x22   : > { %v246_v27 = vmul.f32 9.9, %v214_v20  ;;  %v275_v29 = vceil.f32 %v243_v23  ;;  %v273_v30 = vceil.f32 %v241_v24  ;;  %v215_v36 = vmin.f32 %v183_v22, 10.0  ;;  %s3820_s28 = sshll.u32 %s3885_s27, 4  ;;  %s3821_s28 = int_to_ptr.vmem [resolvable:$false] %s3820_s28 }
  0x23   : > { %v276_v31 = vceil.f32 %v244_v25  ;;  %v274_v33 = vceil.f32 %v242_v26  ;;  %v277_v35 = vceil.f32 %v245_v28  ;;  %v248_v40 = vmul.f32 9.9, %v216_v32  ;;  %v160_v26 = vld [vmem:[%s3957_s25 + $0x78] sm:$0xff]  ;;  %s3822_s29 = scalar_lea.vmem %s3821_s28, 8192  ;;  %p3823_p0 = scmp.lt.s32.totalorder %s4954_s22, %s3821_s28 }
  0x24   : > { %v278_v34 = vceil.f32 %v246_v27  ;;  %v307_v37 = vmax.f32 %v275_v29, 0.0  ;;  %v305_v38 = vmax.f32 %v273_v30, 0.0  ;;  %v247_v44 = vmul.f32 9.9, %v215_v36  ;;  %v159_v27 = vld [vmem:[%s3957_s25 + $0x70] sm:$0xff]  ;;  %p3824_p1 = scmp.lt.s32.totalorder %s3822_s29, %s3816_s13 }
  0x25   : > { %v308_v39 = vmax.f32 %v276_v31, 0.0  ;;  %v306_v41 = vmax.f32 %v274_v33, 0.0  ;;  %v309_v43 = vmax.f32 %v277_v35, 0.0  ;;  %v280_v48 = vceil.f32 %v248_v40 }
  0x26   : > { %v310_v42 = vmax.f32 %v278_v34, 0.0  ;;  %v339_v45 = vmin.f32 %v307_v37, 99.0  ;;  %v337_v46 = vmin.f32 %v305_v38, 99.0  ;;  %v279_v52 = vceil.f32 %v247_v44  ;;  %p3825_p2 = por %p3824_p1, %p3823_p0 }
  0x27   : > { %v340_v47 = vmin.f32 %v308_v39, 99.0  ;;  %v338_v49 = vmin.f32 %v306_v41, 99.0  ;;  %v341_v51 = vmin.f32 %v309_v43, 99.0  ;;  %v312_v56 = vmax.f32 %v280_v48, 0.0 }
  0x28   : > { %v342_v50 = vmin.f32 %v310_v42, 99.0  ;;  %v3680_v53 = vtrunc.f32 %v339_v45  ;;  %v3676_v54 = vtrunc.f32 %v337_v46  ;;  %v311_v58 = vmax.f32 %v279_v52, 0.0  ;;  %p3826_p3 = pnand %p3825_p2, %p3819_p13 }
  0x29   : > { %v3682_v55 = vtrunc.f32 %v340_v47  ;;  %v3678_v57 = vtrunc.f32 %v338_v49  ;;  %v344_v2 = vmin.f32 %v312_v56, 99.0  ;;  %v3684_v8 = vtrunc.f32 %v341_v51 }
  0x2a   : > { %v3970_v62 = vcvt.f32.s32 %v3680_v53  ;;  %v3972_v63 = vcvt.f32.s32 %v3676_v54  ;;  %v3686_v1 = vtrunc.f32 %v342_v50  ;;  %v343_v9 = vmin.f32 %v311_v58, 99.0 }
  0x2b   : > { %v3977_v6 = vcvt.f32.s32 %v3682_v55  ;;  %v3979_v7 = vcvt.f32.s32 %v3678_v57  ;;  %v3690_v10 = vtrunc.f32 %v344_v2  ;;  %v186_v11 = vmax.f32 %v154_v59, 0.0 }
  0x2c   : > { %410 = vperm.xlu1 %3787, %v3970_v62   ;;  %404 = vperm.xlu0 %3786, %v3972_v63   ;;  %v185_v12 = vmax.f32 %v153_v60, 0.0  ;;  %v188_v13 = vmax.f32 %v156_v61, 0.0  ;;  %v3688_v14 = vtrunc.f32 %v343_v9  ;;  %v187_v15 = vmax.f32 %v155_v3, 0.0  ;;  %v162_v9 = vld [vmem:[%s3957_s25 + $0x88] sm:$0xff] }
  0x2d   : > { %v190_v16 = vmax.f32 %v158_v4, 0.0  ;;  %v189_v17 = vmax.f32 %v157_v5, 0.0  ;;  %v3983_v18 = vcvt.f32.s32 %v3686_v1  ;;  %v218_v19 = vmin.f32 %v186_v11, 10.0  ;;  %v164_v11 = vld [vmem:[%s3957_s25 + $0x98] sm:$0xff] }
  0x2e   : > { %v217_v20 = vmin.f32 %v185_v12, 10.0  ;;  %v220_v21 = vmin.f32 %v188_v13, 10.0  ;;  %v3985_v22 = vcvt.f32.s32 %v3684_v8  ;;  %v219_v23 = vmin.f32 %v187_v15, 10.0 }
  0x2f   : > { %v222_v24 = vmin.f32 %v190_v16, 10.0  ;;  %v221_v25 = vmin.f32 %v189_v17, 10.0  ;;  %v3991_v28 = vcvt.f32.s32 %v3690_v10  ;;  %v250_v29 = vmul.f32 9.9, %v218_v19  ;;  %v161_v10 = vld [vmem:[%s3957_s25 + $0x80] sm:$0xff]  ;;  %v163_v16 = vld [vmem:[%s3957_s25 + $0x90] sm:$0xff] }
  0x30   : > { %413 = vperm.xlu1 %3787, %v3977_v6   ;;  %407 = vperm.xlu0 %3786, %v3979_v7   ;;  %v249_v30 = vmul.f32 9.9, %v217_v20  ;;  %v252_v31 = vmul.f32 9.9, %v220_v21  ;;  %v3993_v32 = vcvt.f32.s32 %v3688_v14  ;;  %v251_v33 = vmul.f32 9.9, %v219_v23 }
  0x31   : > { %v254_v34 = vmul.f32 9.9, %v222_v24  ;;  %v253_v35 = vmul.f32 9.9, %v221_v25  ;;  %v282_v36 = vceil.f32 %v250_v29  ;;  %v192_v39 = vmax.f32 %v160_v26, 0.0  ;;  %v166_v17 = vld [vmem:[%s3957_s25 + $0xa8] sm:$0xff] }
  0x32   : > { %v281_v37 = vceil.f32 %v249_v30  ;;  %v284_v38 = vceil.f32 %v252_v31  ;;  %v283_v40 = vceil.f32 %v251_v33  ;;  %v191_v43 = vmax.f32 %v159_v27, 0.0  ;;  %v165_v19 = vld [vmem:[%s3957_s25 + $0xa0] sm:$0xff] }
  0x33   : > { %v286_v41 = vceil.f32 %v254_v34  ;;  %v285_v42 = vceil.f32 %v253_v35  ;;  %v314_v44 = vmax.f32 %v282_v36, 0.0  ;;  %v224_v47 = vmin.f32 %v192_v39, 10.0 }
  0x34   : > { %419 = vperm.xlu1 %3787, %v3983_v18   ;;  %416 = vperm.xlu0 %3786, %v3985_v22   ;;  %v313_v45 = vmax.f32 %v281_v37, 0.0  ;;  %v316_v46 = vmax.f32 %v284_v38, 0.0  ;;  %v315_v48 = vmax.f32 %v283_v40, 0.0  ;;  %v223_v51 = vmin.f32 %v191_v43, 10.0  ;;  %v168_v43 = vld [vmem:[%s3957_s25 + $0xb8] sm:$0xff] }
  0x35   : > { %v318_v49 = vmax.f32 %v286_v41, 0.0  ;;  %v317_v50 = vmax.f32 %v285_v42, 0.0  ;;  %v346_v52 = vmin.f32 %v314_v44, 99.0  ;;  %v256_v55 = vmul.f32 9.9, %v224_v47  ;;  %v167_v44 = vld [vmem:[%s3957_s25 + $0xb0] sm:$0xff] }
  0x36   : > { %v345_v53 = vmin.f32 %v313_v45, 99.0  ;;  %v348_v54 = vmin.f32 %v316_v46, 99.0  ;;  %v347_v56 = vmin.f32 %v315_v48, 99.0  ;;  %v255_v59 = vmul.f32 9.9, %v223_v51 }
  0x37   : > { %v350_v57 = vmin.f32 %v318_v49, 99.0  ;;  %v349_v58 = vmin.f32 %v317_v50, 99.0  ;;  %v3694_v60 = vtrunc.f32 %v346_v52  ;;  %v288_v2 = vceil.f32 %v256_v55 }
  0x38   : > { %425 = vperm.xlu1 %3787, %v3991_v28   ;;  %422 = vperm.xlu0 %3786, %v3993_v32   ;;  %v3692_v61 = vtrunc.f32 %v345_v53  ;;  %v3698_v1 = vtrunc.f32 %v348_v54  ;;  %v3696_v3 = vtrunc.f32 %v347_v56  ;;  %v287_v8 = vceil.f32 %v255_v59 }
  0x39   : > { %v3702_v4 = vtrunc.f32 %v350_v57  ;;  %v3700_v5 = vtrunc.f32 %v349_v58  ;;  %v4002_v12 = vcvt.f32.s32 %v3694_v60  ;;  %v320_v15 = vmax.f32 %v288_v2, 0.0 }
  0x3a   : > { %v4004_v13 = vcvt.f32.s32 %v3692_v61  ;;  %v4006_v14 = vcvt.f32.s32 %v3698_v1  ;;  %v4011_v20 = vcvt.f32.s32 %v3696_v3  ;;  %v319_v24 = vmax.f32 %v287_v8, 0.0 }
  0x3b   : > { %v4013_v21 = vcvt.f32.s32 %v3702_v4  ;;  %v4015_v23 = vcvt.f32.s32 %v3700_v5  ;;  %v352_v25 = vmin.f32 %v320_v15, 99.0  ;;  %v194_v26 = vmax.f32 %v162_v9, 0.0 }
  0x3c   : > { %431 = vperm.xlu1 %3787, %v4002_v12   ;;  %428 = vperm.xlu0 %3786, %v4004_v13   ;;  %v193_v27 = vmax.f32 %v161_v10, 0.0  ;;  %v196_v29 = vmax.f32 %v164_v11, 0.0  ;;  %v351_v30 = vmin.f32 %v319_v24, 99.0  ;;  %v195_v31 = vmax.f32 %v163_v16, 0.0 }
  0x3d   : > { %v198_v33 = vmax.f32 %v166_v17, 0.0  ;;  %v197_v34 = vmax.f32 %v165_v19, 0.0  ;;  %v3706_v35 = vtrunc.f32 %v352_v25  ;;  %v226_v36 = vmin.f32 %v194_v26, 10.0 }
  0x3e   : > { %v225_v37 = vmin.f32 %v193_v27, 10.0  ;;  %v228_v38 = vmin.f32 %v196_v29, 10.0  ;;  %v3704_v39 = vtrunc.f32 %v351_v30  ;;  %v227_v40 = vmin.f32 %v195_v31, 10.0 }
  0x3f   : > { %v230_v41 = vmin.f32 %v198_v33, 10.0  ;;  %v229_v42 = vmin.f32 %v197_v34, 10.0  ;;  %v4023_v45 = vcvt.f32.s32 %v3706_v35  ;;  %v258_v46 = vmul.f32 9.9, %v226_v36  ;;  %v170_v34 = vld [vmem:[%s3957_s25 + $0xc8] sm:$0xff]  ;;  %v169_v35 = vld [vmem:[%s3957_s25 + $0xc0] sm:$0xff] }
  0x40   : > { %437 = vperm.xlu1 %3787, %v4006_v14   ;;  %434 = vperm.xlu0 %3786, %v4011_v20   ;;  %v257_v47 = vmul.f32 9.9, %v225_v37  ;;  %v260_v48 = vmul.f32 9.9, %v228_v38  ;;  %v4025_v49 = vcvt.f32.s32 %v3704_v39  ;;  %v259_v50 = vmul.f32 9.9, %v227_v40 }
  0x41   : > { %v262_v51 = vmul.f32 9.9, %v230_v41  ;;  %v261_v52 = vmul.f32 9.9, %v229_v42  ;;  %v290_v53 = vceil.f32 %v258_v46  ;;  %v200_v56 = vmax.f32 %v168_v43, 0.0 }
  0x42   : > { %v289_v54 = vceil.f32 %v257_v47  ;;  %v292_v55 = vceil.f32 %v260_v48  ;;  %v291_v57 = vceil.f32 %v259_v50  ;;  %v199_v60 = vmax.f32 %v167_v44, 0.0 }
  0x43   : > { %v294_v58 = vceil.f32 %v262_v51  ;;  %v293_v59 = vceil.f32 %v261_v52  ;;  %v322_v61 = vmax.f32 %v290_v53, 0.0  ;;  %v232_v3 = vmin.f32 %v200_v56, 10.0 }
  0x44   : > { %443 = vperm.xlu1 %3787, %v4013_v21   ;;  %440 = vperm.xlu0 %3786, %v4015_v23   ;;  %v321_v1 = vmax.f32 %v289_v54, 0.0  ;;  %v324_v2 = vmax.f32 %v292_v55, 0.0  ;;  %v323_v4 = vmax.f32 %v291_v57, 0.0  ;;  %v231_v9 = vmin.f32 %v199_v60, 10.0 }
  0x45   : > { %v326_v5 = vmax.f32 %v294_v58, 0.0  ;;  %v325_v8 = vmax.f32 %v293_v59, 0.0  ;;  %v354_v10 = vmin.f32 %v322_v61, 99.0  ;;  %v264_v16 = vmul.f32 9.9, %v232_v3  ;;  %v2878_v61 = vld [vmem:[%s5002_s1 + $0xd0] sm:$0xff] }
  0x46   : > { %v353_v11 = vmin.f32 %v321_v1, 99.0  ;;  %v356_v15 = vmin.f32 %v324_v2, 99.0  ;;  %v355_v17 = vmin.f32 %v323_v4, 99.0  ;;  %v263_v25 = vmul.f32 9.9, %v231_v9  ;;  %v2879_v1 = vld [vmem:[%s5002_s1 + $0xd8] sm:$0xff] }
  0x47   : > { %v358_v19 = vmin.f32 %v326_v5, 99.0  ;;  %v357_v24 = vmin.f32 %v325_v8, 99.0  ;;  %v3710_v26 = vtrunc.f32 %v354_v10  ;;  %v296_v30 = vceil.f32 %v264_v16  ;;  %v2880_v10 = vld [vmem:[%s5002_s1 + $0xe0] sm:$0xff] }
  0x48   : > { %449 = vperm.xlu1 %3787, %v4023_v45   ;;  %446 = vperm.xlu0 %3786, %v4025_v49   ;;  %v3708_v27 = vtrunc.f32 %v353_v11  ;;  %v3714_v29 = vtrunc.f32 %v356_v15  ;;  %v3712_v31 = vtrunc.f32 %v355_v17  ;;  %v295_v33 = vceil.f32 %v263_v25  ;;  %v2881_v11 = vld [vmem:[%s5002_s1 + $0xe8] sm:$0xff] }
  0x49   : > { %v4033_v36 = vcvt.f32.s32 %v3710_v26  ;;  %v328_v38 = vmax.f32 %v296_v30, 0.0  ;;  %v3718_v40 = vtrunc.f32 %v358_v19  ;;  %v3716_v41 = vtrunc.f32 %v357_v24  ;;  %v2767_v19 = vld [vmem:[%s5002_s1 + $0x68] sm:$0xff]  ;;  %v2768_v24 = vld [vmem:[%s5002_s1 + $0x70] sm:$0xff]  ;;  %v2883_v30 = vld [vmem:[%s5002_s1 + $0xf8] sm:$0xff] }
  0x4a   : > { %v4035_v37 = vcvt.f32.s32 %v3708_v27  ;;  %v4037_v39 = vcvt.f32.s32 %v3714_v29  ;;  %v327_v42 = vmax.f32 %v295_v33, 0.0  ;;  %v4041_v43 = vcvt.f32.s32 %v3712_v31  ;;  %v2882_v29 = vld [vmem:[%s5002_s1 + $0xf0] sm:$0xff]  ;;  %v2769_v33 = vld [vmem:[%s5002_s1 + $0x78] sm:$0xff] }
  0x4b   : > { %v360_v44 = vmin.f32 %v328_v38, 99.0  ;;  %v202_v46 = vmax.f32 %v170_v34, 0.0  ;;  %v201_v47 = vmax.f32 %v169_v35, 0.0  ;;  %v4043_v52 = vcvt.f32.s32 %v3718_v40  ;;  %v2770_v34 = vld [vmem:[%s5002_s1 + $0x80] sm:$0xff]  ;;  %v2885_v40 = vld [vmem:[%s5002_s1 + $0x108] sm:$0xff] }
  0x4c   : > { %455 = vperm.xlu1 %3787, %v4033_v36   ;;  %452 = vperm.xlu0 %3786, %v4035_v37   ;;  %v359_v48 = vmin.f32 %v327_v42, 99.0  ;;  %v4047_v54 = vcvt.f32.s32 %v3716_v41  ;;  %v3532_v5 = vpack.c.bf16 %v2879_v1, %v2878_v61  ;;  %v3536_v17 = vpack.c.bf16 %v2881_v11, %v2880_v10  ;;  %v2884_v38 = vld [vmem:[%s5002_s1 + $0x100] sm:$0xff]  ;;  %v2775_v1 = vld [vmem:[%s5002_s1 + $0xa8] sm:$0xff] }
  0x4d   : > { %v234_v50 = vmin.f32 %v202_v46, 10.0  ;;  %v233_v51 = vmin.f32 %v201_v47, 10.0  ;;  %v3722_v53 = vtrunc.f32 %v360_v44  ;;  %v3484_v25 = vpack.c.bf16 %v2768_v24, %v2767_v19  ;;  %v2771_v44 = vld [vmem:[%s5002_s1 + $0x88] sm:$0xff]  ;;  %v2772_v46 = vld [vmem:[%s5002_s1 + $0x90] sm:$0xff] }
  0x4e   : > { %v3720_v55 = vtrunc.f32 %v359_v48  ;;  %3533 = vmatprep.subr.bf16.mxu0 %v3532_v5  ;;  %v3540_v31 = vpack.c.bf16 %v2883_v30, %v2882_v29  ;;  %v3488_v35 = vpack.c.bf16 %v2770_v34, %v2769_v33  ;;  %v5006_v41 = vmov 2   ;;  %v2886_v48 = vld [vmem:[%s5002_s1 + $0x110] sm:$0xff]  ;;  %v2779_v11 = vld [vmem:[%s5002_s1 + $0xc8] sm:$0xf] }
  0x4f   : > { %v266_v56 = vmul.f32 9.9, %v234_v50  ;;  %v265_v57 = vmul.f32 9.9, %v233_v51  ;;  %v4049_v60 = vcvt.f32.s32 %v3722_v53  ;;  %3535 = vmatpush3.bf16.msra.mxu0 %v3532_v5  ;;  %3485 = vmatprep.subr.bf16.mxu1 %v3484_v25  ;;  %v3544_v42 = vpack.c.bf16 %v2885_v40, %v2884_v38  ;;  %v2887_v50 = vld [vmem:[%s5002_s1 + $0x118] sm:$0xff] }
  0x50   : > { %461 = vperm.xlu1 %3787, %v4037_v39   ;;  %458 = vperm.xlu0 %3786, %v4041_v43   ;;  %v4059_v2 = vcvt.f32.s32 %v3720_v55  ;;  %v3492_v47 = vpack.c.bf16 %v2772_v46, %v2771_v44  ;;  %v3548_v51 = vpack.c.bf16 %v2887_v50, %v2886_v48  ;;  %v2773_v53 = vld [vmem:[%s5002_s1 + $0x98] sm:$0xff]  ;;  %v2774_v55 = vld [vmem:[%s5002_s1 + $0xa0] sm:$0xff] }
  0x51   : > { %v298_v58 = vceil.f32 %v266_v56  ;;  %v297_v59 = vceil.f32 %v265_v57  ;;  %3537 = vmatprep.subr.bf16.mxu0 %v3536_v17  ;;  %3487 = vmatpush3.bf16.msra.mxu1 %v3484_v25  ;;  %v3882_v56 = vmov 1   ;;  %v3496_v57 = vpack.c.bf16 %v2774_v55, %v2773_v53  ;;  %v2777_v5 = vld [vmem:[%s5002_s1 + $0xb8] sm:$0xff]  ;;  %v173_v44 = vld [vmem:[%s3957_s25 + $0xe0] sm:$0xff] }
  0x52   : > { %3489 = vmatprep.subr.bf16.mxu1 %v3488_v35  ;;  %v205_v48 = vmax.f32 %v173_v44, 0.0  ;;  %v176_v50 = vld [vmem:[%s3957_s25 + $0xf8] sm:$0xff] }
  0x53   : > { %v330_v3 = vmax.f32 %v298_v58, 0.0  ;;  %v329_v4 = vmax.f32 %v297_v59, 0.0  ;;  %3539 = vmatpush3.bf16.msra.mxu0 %v3536_v17  ;;  %v2888_v58 = vld [vmem:[%s5002_s1 + $0x120] sm:$0xff]  ;;  %v2889_v59 = vld [vmem:[%s5002_s1 + $0x128] sm:$0xff]  ;;  %v175_v17 = vld [vmem:[%s3957_s25 + $0xf0] sm:$0xff]  ;;  %v208_v55 = vmax.f32 %v176_v50, 0.0 }
  0x54   : > { %467 = vperm.xlu1 %3787, %v4043_v52   ;;  %464 = vperm.xlu0 %3786, %v4047_v54   ;;  %v3552_v61 = vpack.c.bf16 %v2889_v59, %v2888_v58  ;;  %v207_v24 = vmax.f32 %v175_v17, 0.0  ;;  %v237_v53 = vmin.f32 %v205_v48, 10.0  ;;  %v171_v50 = vld [vmem:[%s3957_s25 + $0xd0] sm:$0xff] }
  0x55   : > { %v362_v8 = vmin.f32 %v330_v3, 99.0  ;;  %v361_v9 = vmin.f32 %v329_v4, 99.0  ;;  %3541 = vmatprep.subr.bf16.mxu0 %v3540_v31  ;;  %3491 = vmatpush3.bf16.msra.mxu1 %v3488_v35  ;;  %v2776_v3 = vld [vmem:[%s5002_s1 + $0xb0] sm:$0xff]  ;;  %v240_v58 = vmin.f32 %v208_v55, 10.0  ;;  %v203_v55 = vmax.f32 %v171_v50, 0.0 }
  0x56   : > { %3493 = vmatprep.subr.bf16.mxu1 %v3492_v47  ;;  %v3500_v4 = vpack.c.bf16 %v2776_v3, %v2775_v1  ;;  %v239_v29 = vmin.f32 %v207_v24, 10.0  ;;  %v3884_v50 = vmov 0.0  }
  0x57   : > { %v3726_v15 = vtrunc.f32 %v362_v8  ;;  %v3724_v16 = vtrunc.f32 %v361_v9  ;;  %3543 = vmatpush3.bf16.msra.mxu0 %v3540_v31  ;;  %v2778_v8 = vld [vmem:[%s5002_s1 + $0xc0] sm:$0xff]  ;;  %v2890_v9 = vld [vmem:[%s5002_s1 + $0x130] sm:$0xf] }
  0x58   : > { %473 = vperm.xlu1 %3787, %v4049_v60   ;;  %470 = vperm.xlu0 %3786, %v4059_v2   ;;  %v3504_v10 = vpack.c.bf16 %v2778_v8, %v2777_v5  ;;  %v271_v31 = vmul.f32 9.9, %v239_v29 }
  0x59   : > { %v4075_v26 = vcvt.f32.s32 %v3726_v15  ;;  %v4077_v27 = vcvt.f32.s32 %v3724_v16  ;;  %3545 = vmatprep.subr.bf16.mxu0 %v3544_v42  ;;  %3495 = vmatpush3.bf16.msra.mxu1 %v3492_v47  ;;  %v172_v15 = vld [vmem:[%s3957_s25 + $0xd8] sm:$0xff] }
  0x5a   : > { %3497 = vmatprep.subr.bf16.mxu1 %v3496_v57  ;;  %v204_v16 = vmax.f32 %v172_v15, 0.0  ;;  %v303_v34 = vceil.f32 %v271_v31 }
  0x5b   : > { %3547 = vmatpush3.bf16.msra.mxu0 %v3544_v42 }
  0x5c   : > { %479 = vperm.xlu1 %3787, %v4075_v26   ;;  %476 = vperm.xlu0 %3786, %v4077_v27   ;;  %v236_v19 = vmin.f32 %v204_v16, 10.0  ;;  %v335_v38 = vmax.f32 %v303_v34, 0.0 }
  0x5d   : > { %3549 = vmatprep.subr.bf16.mxu0 %v3548_v51  ;;  %3499 = vmatpush3.bf16.msra.mxu1 %v3496_v57  ;;  %v269_v57 = vmul.f32 9.9, %v237_v53 }
  0x5e   : > { %3501 = vmatprep.subr.bf16.mxu1 %v3500_v4  ;;  %v268_v25 = vmul.f32 9.9, %v236_v19  ;;  %v367_v42 = vmin.f32 %v335_v38, 99.0 }
  0x5f   : > { %3551 = vmatpush3.bf16.msra.mxu0 %v3548_v51  ;;  %v301_v59 = vceil.f32 %v269_v57 }
  0x60   : > { %3788 = vset.pattern.permute.xlu1 %v5006_v41  ;;  %3790 = vset.pattern.permute.xlu0 %v5006_v41  ;;  %v300_v30 = vceil.f32 %v268_v25  ;;  %v3736_v47 = vtrunc.f32 %v367_v42 }
  0x61   : > { %1465 = vperm.xlu1 %3788, %v3972_v63   ;;  %1468 = vperm.xlu0 %3790, %v3979_v7   ;;  %v333_v1 = vmax.f32 %v301_v59, 0.0 }
  0x62   : > { %3553 = vmatprep.subr.bf16.mxu0 %v3552_v61  ;;  %3503 = vmatpush3.bf16.msra.mxu1 %v3500_v4  ;;  %v332_v33 = vmax.f32 %v300_v30, 0.0  ;;  %v4186_v51 = vcvt.f32.s32 %v3736_v47 }
  0x63   : > { %3555 = vmatpush3.bf16.msra.mxu0 %v3552_v61  ;;  %3505 = vmatprep.subr.bf16.mxu1 %v3504_v10  ;;  %v272_v61 = vmul.f32 9.9, %v240_v58  ;;  %v365_v4 = vmin.f32 %v333_v1, 99.0 }
  0x64   : > { %3360 = vmatprep.subr.msk.mxu0 %vm911_vm0, %v2890_v9  ;;  %v364_v35 = vmin.f32 %v332_v33, 99.0 }
  0x65   : > { %3789 = vset.pattern.permute.xlu1 %v3882_v56  ;;  %1477 = vperm.xlu0 %3790, %v3985_v22   ;;  %v304_v3 = vceil.f32 %v272_v61 }
  0x66   : > { %612 = vperm.xlu1 %3789, %v3979_v7   ;;  %3507 = vmatpush3.bf16.msra.mxu1 %v3504_v10  ;;  %v3730_v40 = vtrunc.f32 %v364_v35  ;;  %v3732_v10 = vtrunc.f32 %v365_v4  ;;  %v5005_v35 = vmov 3  }
  0x67   : > { %3361 = vmatpush3.msk.msra.mxu0 %vm911_vm0, %v2890_v9  ;;  %3212 = vmatprep.subr.msk.mxu1 %vm911_vm0, %v2779_v11  ;;  %v336_v5 = vmax.f32 %v304_v3, 0.0 }
  0x68   : > { %v4181_v46 = vcvt.f32.s32 %v3730_v40  ;;  %v4212_v17 = vcvt.f32.s32 %v3732_v10 }
  0x69   : > { %1486 = vperm.xlu0 %3790, %v3991_v28  }
  0x6a   : > { %615 = vperm.xlu1 %3789, %v3970_v62   ;;  %3213 = vmatpush3.msk.msra.mxu1 %vm911_vm0, %v2779_v11  ;;  %v368_v11 = vmin.f32 %v336_v5, 99.0 }
  0x6c   : > { %v3738_v19 = vtrunc.f32 %v368_v11 }
  0x6d   : > { %1495 = vperm.xlu0 %3790, %v4011_v20  }
  0x6e   : > { %3791 = vset.pattern.permute.xlu1 %v5006_v41  ;;  %v4220_v29 = vcvt.f32.s32 %v3738_v19 }
  0x6f   : > { %1471 = vperm.xlu1 %3791, %v3970_v62  }
  0x71   : > { %3797 = vset.pattern.permute.xlu0 %v3882_v56 }
  0x72   : > { %609 = vperm.xlu0 %3797, %v3972_v63  }
  0x73   : > { %1474 = vperm.xlu1 %3791, %v3977_v6  }
  0x76   : > { %618 = vperm.xlu0 %3797, %v3977_v6  }
  0x77   : > { %3792 = vset.pattern.permute.xlu1 %v3882_v56 }
  0x78   : > { %621 = vperm.xlu1 %3792, %v3985_v22  }
  0x7a   : > { %627 = vperm.xlu0 %3797, %v3993_v32  }
  0x7c   : > { %624 = vperm.xlu1 %3792, %v3983_v18  }
  0x7e   : > { %636 = vperm.xlu0 %3797, %v4002_v12  }
  0x80   : > { %3793 = vset.pattern.permute.xlu1 %v5006_v41 }
  0x81   : > { %1480 = vperm.xlu1 %3793, %v3983_v18  }
  0x82   : > { %645 = vperm.xlu0 %3797, %v4015_v23  }
  0x85   : > { %1483 = vperm.xlu1 %3793, %v3993_v32  }
  0x86   : > { %654 = vperm.xlu0 %3797, %v4023_v45  }
  0x89   : > { %3794 = vset.pattern.permute.xlu1 %v3882_v56 }
  0x8a   : > { %630 = vperm.xlu1 %3794, %v3991_v28   ;;  %663 = vperm.xlu0 %3797, %v4041_v43  }
  0x8e   : > { %633 = vperm.xlu1 %3794, %v4004_v13   ;;  %672 = vperm.xlu0 %3797, %v4043_v52  }
  0x92   : > { %3795 = vset.pattern.permute.xlu1 %v5006_v41  ;;  %681 = vperm.xlu0 %3797, %v4077_v27  }
  0x93   : > { %1489 = vperm.xlu1 %3795, %v4004_v13  }
  0x96   : > { %690 = vperm.xlu0 %3797, %v4181_v46  }
  0x97   : > { %1492 = vperm.xlu1 %3795, %v4002_v12  }
  0x9a   : > { %699 = vperm.xlu0 %3797, %v4186_v51  }
  0x9b   : > { %3796 = vset.pattern.permute.xlu1 %v3882_v56 }
  0x9c   : > { %639 = vperm.xlu1 %3796, %v4011_v20  }
  0x9e   : > { %3811 = vset.pattern.permute.xlu0 %v5006_v41 }
  0x9f   : > { %1504 = vperm.xlu0 %3811, %v4013_v21  }
  0xa0   : > { %642 = vperm.xlu1 %3796, %v4006_v14  }
  0xa3   : > { %1513 = vperm.xlu0 %3811, %v4035_v37  }
  0xa4   : > { %3798 = vset.pattern.permute.xlu1 %v5006_v41 }
  0xa5   : > { %1498 = vperm.xlu1 %3798, %v4006_v14  }
  0xa7   : > { %1522 = vperm.xlu0 %3811, %v4037_v39  }
  0xa9   : > { %1501 = vperm.xlu1 %3798, %v4015_v23  }
  0xab   : > { %v4200_v8 = vpop.permute.xlu1 %410  ;;  %v4202_v9 = vpop.permute.xlu0 %404  ;;  %1531 = vperm.xlu0 %3811, %v4059_v2  }
  0xad   : > { %3799 = vset.pattern.permute.xlu1 %v3882_v56 }
  0xae   : > { %648 = vperm.xlu1 %3799, %v4013_v21  }
  0xaf   : > { %v4207_v15 = vpop.permute.xlu1 %413  ;;  %v4209_v16 = vpop.permute.xlu0 %407  ;;  %1540 = vperm.xlu0 %3811, %v4075_v26  }
  0xb2   : > { %651 = vperm.xlu1 %3799, %v4025_v49  }
  0xb3   : > { %v4215_v24 = vpop.permute.xlu1 %419  ;;  %v4217_v25 = vpop.permute.xlu0 %416  ;;  %1549 = vperm.xlu0 %3811, %v4212_v17  }
  0xb6   : > { %3800 = vset.pattern.permute.xlu1 %v5006_v41 }
  0xb7   : > { %v4223_v30 = vpop.permute.xlu1 %425  ;;  %1507 = vperm.xlu1 %3800, %v4025_v49   ;;  %v4226_v31 = vpop.permute.xlu0 %422  ;;  %1558 = vperm.xlu0 %3811, %v4220_v29  }
  0xbb   : > { %v4229_v33 = vpop.permute.xlu1 %431  ;;  %1510 = vperm.xlu1 %3800, %v4023_v45   ;;  %v4232_v34 = vpop.permute.xlu0 %428  ;;  %3814 = vset.pattern.permute.xlu0 %v5005_v35 }
  0xbc   : > { %2033 = vperm.xlu0 %3814, %v3970_v62  }
  0xbf   : > { %v4236_v38 = vpop.permute.xlu1 %437  ;;  %3801 = vset.pattern.permute.xlu1 %v3882_v56  ;;  %v4239_v40 = vpop.permute.xlu0 %434 }
  0xc0   : > { %657 = vperm.xlu1 %3801, %v4035_v37   ;;  %2042 = vperm.xlu0 %3814, %v3983_v18  }
  0xc3   : > { %v4243_v42 = vpop.permute.xlu1 %443  ;;  %v4245_v44 = vpop.permute.xlu0 %440 }
  0xc4   : > { %660 = vperm.xlu1 %3801, %v4033_v36   ;;  %2048 = vperm.xlu0 %3814, %v3991_v28  }
  0xc7   : > { %v4249_v62 = vpop.permute.xlu1 %449  ;;  %v4251_v47 = vpop.permute.xlu0 %446 }
  0xc8   : > { %3802 = vset.pattern.permute.xlu1 %v5006_v41  ;;  %2054 = vperm.xlu0 %3814, %v4002_v12  }
  0xc9   : > { %1516 = vperm.xlu1 %3802, %v4033_v36  }
  0xcb   : > { %v4256_v48 = vpop.permute.xlu1 %455  ;;  %v4258_v18 = vpop.permute.xlu0 %452 }
  0xcc   : > { %2060 = vperm.xlu0 %3814, %v4006_v14   ;;  %v235_v14 = vmin.f32 %v203_v55, 10.0 }
  0xcd   : > { %1519 = vperm.xlu1 %3802, %v4041_v43  }
  0xce   : > { %v267_v61 = vmul.f32 9.9, %v235_v14 }
  0xcf   : > { %v4263_v28 = vpop.permute.xlu1 %461  ;;  %v4265_v53 = vpop.permute.xlu0 %458 }
  0xd0   : > { %2066 = vperm.xlu0 %3814, %v4013_v21   ;;  %v401_v21 = vlaneseq  ;;  %v299_v4 = vceil.f32 %v267_v61 }
  0xd1   : > { %3803 = vset.pattern.permute.xlu1 %v3882_v56 }
  0xd2   : > { %666 = vperm.xlu1 %3803, %v4037_v39   ;;  %v4289_v10 = vand.u32 127, %v401_v21  ;;  %v331_v11 = vmax.f32 %v299_v4, 0.0 }
  0xd3   : > { %v4270_v12 = vpop.permute.xlu1 %467  ;;  %v4272_v57 = vpop.permute.xlu0 %464 }
  0xd4   : > { %2072 = vperm.xlu0 %3814, %v4023_v45   ;;  %v174_v45 = vld [vmem:[%s3957_s25 + $0xe8] sm:$0xff]  ;;  %v363_v61 = vmin.f32 %v331_v11, 99.0 }
  0xd5   : > { %v206_v5 = vmax.f32 %v174_v45, 0.0 }
  0xd6   : > { %669 = vperm.xlu1 %3803, %v4047_v54   ;;  %v3728_v45 = vtrunc.f32 %v363_v61 }
  0xd7   : > { %v4276_v58 = vpop.permute.xlu1 %473  ;;  %v4278_v59 = vpop.permute.xlu0 %470  ;;  %v238_v14 = vmin.f32 %v206_v5, 10.0 }
  0xd8   : > { %2078 = vperm.xlu0 %3814, %v4033_v36  }
  0xd9   : > { %v270_v4 = vmul.f32 9.9, %v238_v14 }
  0xda   : > { %3804 = vset.pattern.permute.xlu1 %v5006_v41 }
  0xdb   : > { %v4282_v1 = vpop.permute.xlu1 %479  ;;  %1525 = vperm.xlu1 %3804, %v4047_v54   ;;  %v4285_v3 = vpop.permute.xlu0 %476 }
  0xdc   : > { %5010 = vst [vmem:[#allocation5_spill] sm:$0xff] %v4282_v1  ;;  %5011 = vst [vmem:[#allocation6_spill] sm:$0xff] %v4285_v3  ;;  %2084 = vperm.xlu0 %3814, %v4037_v39  }
  0xdf   : > { %1528 = vperm.xlu1 %3804, %v4043_v52  }
  0xe0   : > { %v1466_v36 = vpop.permute.xlu1 %1465  ;;  %v1469_v19 = vpop.permute.xlu0 %1468  ;;  %2090 = vperm.xlu0 %3814, %v4043_v52  }
  0xe1   : > { %vm1561_vm2 = vcmp.eq.s32.totalorder %v4289_v10, %v1469_v19  ;;  %vm1560_vm3 = vcmp.eq.s32.totalorder %v4289_v10, %v1466_v36  ;;  %v302_v19 = vceil.f32 %v270_v4 }
  0xe2   : > { %v2847_v55 = vsel %vm1561_vm2, 1.0, %v3884_v50  ;;  %v2846_v39 = vsel %vm1560_vm3, 1.0, %v3884_v50 }
  0xe3   : > { %3805 = vset.pattern.permute.xlu1 %v3882_v56  ;;  %3362 = vmatprep.mubr.msk.f32.mxu0 %vm814_vm1, %v2846_v39  ;;  %v4306_v39 = vcvt.f32.s32 %v3728_v45  ;;  %v334_v14 = vmax.f32 %v302_v19, 0.0  ;;  %v595_v19 = vld [vmem:[%s5002_s1] sm:$0xff] }
  0xe4   : > { %675 = vperm.xlu1 %3805, %v4059_v2   ;;  %v1478_v21 = vpop.permute.xlu0 %1477  ;;  %3363 = vmatmul.mubr.msk.f32.vlgmr.msra.gmra.mrb[0].mxu0 %vm814_vm1, %v2847_v55 }
  0xe5   : > { %v613_v52 = vpop.permute.xlu1 %612  ;;  %2096 = vperm.xlu0 %3814, %v4049_v60   ;;  %vm1564_vm6 = vcmp.eq.s32.totalorder %v4289_v10, %v1478_v21  ;;  %v366_v45 = vmin.f32 %v334_v14, 99.0 }
  0xe6   : > { %vm705_vm5 = vcmp.eq.s32.totalorder %v4289_v10, %v613_v52  ;;  %v2850_v35 = vsel %vm1564_vm6, 1.0, %v3884_v50 }
  0xe7   : > { %v3734_v21 = vtrunc.f32 %v366_v45  ;;  %v598_v45 = vld [vmem:[%s5002_s1 + $0x18] sm:$0xff] }
  0xe8   : > { %678 = vperm.xlu1 %3805, %v4049_v60   ;;  %v4303_v36 = vpop.permute.xlu0 %1486 }
  0xe9   : > { %v616_v5 = vpop.permute.xlu1 %615  ;;  %2102 = vperm.xlu0 %3814, %v4075_v26   ;;  %vm1567_vm15 = vcmp.eq.s32.totalorder %v4289_v10, %v4303_v36  ;;  %v2960_v36 = vld [vmem:[%s5002_s1 + $0x158] sm:$0xff] }
  0xea   : > { %vm706_vm8 = vcmp.eq.s32.totalorder %v4289_v10, %v616_v5 }
  0xeb   : > { %v2737_v3 = vsel %vm706_vm8, 1.0, %v3884_v50 }
  0xec   : > { %3806 = vset.pattern.permute.xlu1 %v5006_v41  ;;  %v4309_v11 = vpop.permute.xlu0 %1495 }
  0xed   : > { %1534 = vperm.xlu1 %3806, %v4049_v60   ;;  %2105 = vperm.xlu0 %3814, %v4306_v39  }
  0xee   : > { %v1472_v55 = vpop.permute.xlu1 %1471 }
  0xef   : > { %vm1562_vm4 = vcmp.eq.s32.totalorder %v4289_v10, %v1472_v55  ;;  %v596_v55 = vld [vmem:[%s5002_s1 + $0x8] sm:$0xff] }
  0xf0   : > { %v2848_v61 = vsel %vm1562_vm4, 1.0, %v3884_v50  ;;  %v3508_v5 = vpack.c.bf16 %v596_v55, %v595_v19  ;;  %v2958_v55 = vld [vmem:[%s5002_s1 + $0x148] sm:$0xff] }
  0xf1   : > { %1537 = vperm.xlu1 %3806, %v4077_v27   ;;  %3365 = vmatprep.mubr.msk.f32.mxu0 %vm814_vm1, %v2848_v61  ;;  %v610_v4 = vpop.permute.xlu0 %609  ;;  %v2957_v61 = vld [vmem:[%s5002_s1 + $0x140] sm:$0xff] }
  0xf2   : > { %vm704_vm7 = vcmp.eq.s32.totalorder %v4289_v10, %v610_v4  ;;  %v1475_v60 = vpop.permute.xlu1 %1474  ;;  %2108 = vperm.xlu0 %3814, %v4181_v46   ;;  %v2736_v4 = vsel %vm705_vm5, 1.0, %v3884_v50  ;;  %v3556_v1 = vpack.c.bf16 %v2957_v61, %v2956_v0  ;;  %3509 = vmatprep.subr.bf16.mxu1 %v3508_v5 }
  0xf3   : > { %vm1563_vm9 = vcmp.eq.s32.totalorder %v4289_v10, %v1475_v60  ;;  %v2735_v14 = vsel %vm704_vm7, 1.0, %v3884_v50  ;;  %vm1570_vm7 = vcmp.eq.s32.totalorder %v4289_v10, %v4309_v11  ;;  %v2964_v11 = vld [vmem:[%s5002_s1 + $0x178] sm:$0xff] }
  0xf4   : > { %v2849_v41 = vsel %vm1563_vm9, 1.0, %v3884_v50  ;;  %3214 = vmatprep.mubr.msk.f32.mxu1 %vm814_vm1, %v2735_v14  ;;  %3557 = vmatprep.subr.bf16.mxu0 %v3556_v1 }
  0xf5   : > { %3807 = vset.pattern.permute.xlu1 %v3882_v56  ;;  %3215 = vmatmul.mubr.msk.f32.vlgmr.msra.gmra.mrb[0].mxu1 %vm814_vm1, %v2736_v4  ;;  %v619_v60 = vpop.permute.xlu0 %618 }
  0xf6   : > { %3366 = vmatmul.mubr.msk.f32.gmra.mrb[2].mxu0 %vm814_vm1, %v2849_v41  ;;  %684 = vperm.xlu1 %3807, %v4075_v26   ;;  %vm707_vm10 = vcmp.eq.s32.totalorder %v4289_v10, %v619_v60  ;;  %v4360_v41 = vcvt.f32.s32 %v3734_v21  ;;  %v5012_v21 = vmov 2  }
  0xf7   : > { %3217 = vmatprep.mubr.msk.f32.mxu1 %vm814_vm1, %v2737_v3  ;;  %v2738_v52 = vsel %vm707_vm10, 1.0, %v3884_v50  ;;  %v622_v19 = vpop.permute.xlu1 %621  ;;  %3368 = vmatprep.mubr.msk.f32.mxu0 %vm814_vm1, %v2850_v35  ;;  %v597_v3 = vld [vmem:[%s5002_s1 + $0x10] sm:$0xff] }
  0xf8   : > { %vm708_vm11 = vcmp.eq.s32.totalorder %v4289_v10, %v622_v19  ;;  %2111 = vperm.xlu0 %3814, %v4212_v17   ;;  %3511 = vmatpush3.bf16.msra.mxu1 %v3508_v5  ;;  %v3512_v61 = vpack.c.bf16 %v598_v45, %v597_v3  ;;  %v600_v3 = vld [vmem:[%s5002_s1 + $0x28] sm:$0xff]  ;;  %v2853_v45 = vsel %vm1567_vm15, 1.0, %v3884_v50 }
  0xf9   : > { %v2739_v0 = vsel %vm708_vm11, 1.0, %v3884_v50  ;;  %3218 = vmatmul.mubr.msk.f32.gmra.mrb[2].mxu1 %vm814_vm1, %v2738_v52  ;;  %v628_v26 = vpop.permute.xlu0 %627  ;;  %3559 = vmatpush3.bf16.msra.mxu0 %v3556_v1  ;;  %v2959_v1 = vld [vmem:[%s5002_s1 + $0x150] sm:$0xff] }
  0xfa   : > { %687 = vperm.xlu1 %3807, %v4306_v39   ;;  %3220 = vmatprep.mubr.msk.f32.mxu1 %vm814_vm1, %v2739_v0  ;;  %vm710_vm12 = vcmp.eq.s32.totalorder %v4289_v10, %v628_v26  ;;  %v3560_v60 = vpack.c.bf16 %v2959_v1, %v2958_v55 }
  0xfb   : > { %v625_v35 = vpop.permute.xlu1 %624  ;;  %v2741_v14 = vsel %vm710_vm12, 1.0, %v3884_v50  ;;  %3513 = vmatprep.subr.bf16.mxu1 %v3512_v61 }
  0xfc   : > { %vm709_vm13 = vcmp.eq.s32.totalorder %v4289_v10, %v625_v35  ;;  %2114 = vperm.xlu0 %3814, %v4360_v41   ;;  %3561 = vmatprep.subr.bf16.mxu0 %v3560_v60  ;;  %v599_v35 = vld [vmem:[%s5002_s1 + $0x20] sm:$0xff] }
  0xfd   : > { %v2740_v4 = vsel %vm709_vm13, 1.0, %v3884_v50  ;;  %v637_v5 = vpop.permute.xlu0 %636  ;;  %3515 = vmatpush3.bf16.msra.mxu1 %v3512_v61  ;;  %3563 = vmatpush3.bf16.msra.mxu0 %v3560_v60  ;;  %v2961_v61 = vld [vmem:[%s5002_s1 + $0x160] sm:$0xff] }
  0xfe   : > { %3808 = vset.pattern.permute.xlu1 %v5012_v21  ;;  %3221 = vmatmul.mubr.msk.f32.gmra.mrb[4].mxu1 %vm814_vm1, %v2740_v4  ;;  %v3564_v4 = vpack.c.bf16 %v2961_v61, %v2960_v36  ;;  %vm713_vm4 = vcmp.eq.s32.totalorder %v4289_v10, %v637_v5  ;;  %v602_v36 = vld [vmem:[%s5002_s1 + $0x38] sm:$0xff]  ;;  %v2963_v61 = vld [vmem:[%s5002_s1 + $0x170] sm:$0xff] }
  0xff   : > { %1543 = vperm.xlu1 %3808, %v4306_v39   ;;  %3223 = vmatprep.mubr.msk.f32.mxu1 %vm814_vm1, %v2741_v14  ;;  %v3516_v14 = vpack.c.bf16 %v600_v3, %v599_v35  ;;  %v601_v3 = vld [vmem:[%s5002_s1 + $0x30] sm:$0xff]  ;;  %v2744_v5 = vsel %vm713_vm4, 1.0, %v3884_v50 }
 0x100   : > { %v1481_v52 = vpop.permute.xlu1 %1480  ;;  %2117 = vperm.xlu0 %3814, %v4186_v51   ;;  %3565 = vmatprep.subr.bf16.mxu0 %v3564_v4 }
 0x101   : > { %vm1565_vm14 = vcmp.eq.s32.totalorder %v4289_v10, %v1481_v52  ;;  %v4384_v19 = vpop.permute.xlu0 %645  ;;  %3517 = vmatprep.subr.bf16.mxu1 %v3516_v14  ;;  %3567 = vmatpush3.bf16.msra.mxu0 %v3564_v4 }
 0x102   : > { %v2851_v0 = vsel %vm1565_vm14, 1.0, %v3884_v50  ;;  %3519 = vmatpush3.bf16.msra.mxu1 %v3516_v14  ;;  %v3520_v14 = vpack.c.bf16 %v602_v36, %v601_v3  ;;  %v604_v3 = vld [vmem:[%s5002_s1 + $0x48] sm:$0xff]  ;;  %vm716_vm10 = vcmp.eq.s32.totalorder %v4289_v10, %v4384_v19  ;;  %v607_v19 = vld [vmem:[%s5002_s1 + $0x60] sm:$0xf] }
 0x103   : > { %1546 = vperm.xlu1 %3808, %v4181_v46   ;;  %3369 = vmatmul.mubr.msk.f32.gmra.mrb[4].mxu0 %vm814_vm1, %v2851_v0 }
 0x104   : > { %v1484_v26 = vpop.permute.xlu1 %1483  ;;  %2120 = vperm.xlu0 %3814, %v4220_v29   ;;  %3521 = vmatprep.subr.bf16.mxu1 %v3520_v14 }
 0x105   : > { %vm1566_vm2 = vcmp.eq.s32.totalorder %v4289_v10, %v1484_v26  ;;  %v4403_v55 = vpop.permute.xlu0 %654 }
 0x106   : > { %v2852_v1 = vsel %vm1566_vm2, 1.0, %v3884_v50  ;;  %3523 = vmatpush3.bf16.msra.mxu1 %v3520_v14  ;;  %v2856_v14 = vsel %vm1570_vm7, 1.0, %v3884_v50  ;;  %vm719_vm15 = vcmp.eq.s32.totalorder %v4289_v10, %v4403_v55 }
 0x107   : > { %3809 = vset.pattern.permute.xlu1 %v3882_v56  ;;  %3371 = vmatprep.mubr.msk.f32.mxu0 %vm814_vm1, %v2852_v1 }
 0x108   : > { %693 = vperm.xlu1 %3809, %v4212_v17   ;;  %3372 = vmatmul.mubr.msk.f32.gmra.mrb[6].mxu0 %vm814_vm1, %v2853_v45  ;;  %v2962_v45 = vld [vmem:[%s5002_s1 + $0x168] sm:$0xff] }
 0x109   : > { %v631_v60 = vpop.permute.xlu1 %630  ;;  %v4413_v52 = vpop.permute.xlu0 %663  ;;  %v3568_v4 = vpack.c.bf16 %v2963_v61, %v2962_v45 }
 0x10a   : > { %vm711_vm3 = vcmp.eq.s32.totalorder %v4289_v10, %v631_v60  ;;  %vm722_vm7 = vcmp.eq.s32.totalorder %v4289_v10, %v4413_v52 }
 0x10b   : > { %v2742_v0 = vsel %vm711_vm3, 1.0, %v3884_v50  ;;  %3569 = vmatprep.subr.bf16.mxu0 %v3568_v4 }
 0x10c   : > { %696 = vperm.xlu1 %3809, %v4360_v41   ;;  %3224 = vmatmul.mubr.msk.f32.gmra.mrb[6].mxu1 %vm814_vm1, %v2742_v0 }
 0x10d   : > { %v634_v26 = vpop.permute.xlu1 %633  ;;  %v4420_v35 = vpop.permute.xlu0 %672  ;;  %3571 = vmatpush3.bf16.msra.mxu0 %v3568_v4 }
 0x10e   : > { %vm712_vm5 = vcmp.eq.s32.totalorder %v4289_v10, %v634_v26  ;;  %v603_v26 = vld [vmem:[%s5002_s1 + $0x40] sm:$0xff] }
 0x10f   : > { %v2743_v1 = vsel %vm712_vm5, 1.0, %v3884_v50  ;;  %v3524_v36 = vpack.c.bf16 %v604_v3, %v603_v26 }
 0x110   : > { %3810 = vset.pattern.permute.xlu1 %v5012_v21  ;;  %3226 = vmatprep.mubr.msk.f32.mxu1 %vm814_vm1, %v2743_v1 }
 0x111   : > { %1552 = vperm.xlu1 %3810, %v4360_v41   ;;  %3227 = vmatmul.mubr.msk.f32.gmra.mrb[8].mxu1 %vm814_vm1, %v2744_v5  ;;  %v4441_v60 = vpop.permute.xlu0 %681  ;;  %v2965_v5 = vld [vmem:[%s5002_s1 + $0x180] sm:$0xff] }
 0x112   : > { %v1490_v0 = vpop.permute.xlu1 %1489  ;;  %3525 = vmatprep.subr.bf16.mxu1 %v3524_v36  ;;  %v3572_v1 = vpack.c.bf16 %v2965_v5, %v2964_v11  ;;  %v2967_v11 = vld [vmem:[%s5002_s1 + $0x190] sm:$0xff]  ;;  %v5013_v5 = vmov 3  }
 0x113   : > { %vm1568_vm6 = vcmp.eq.s32.totalorder %v4289_v10, %v1490_v0  ;;  %3527 = vmatpush3.bf16.msra.mxu1 %v3524_v36  ;;  %v605_v0 = vld [vmem:[%s5002_s1 + $0x50] sm:$0xff] }
 0x114   : > { %v2854_v21 = vsel %vm1568_vm6, 1.0, %v3884_v50  ;;  %3573 = vmatprep.subr.bf16.mxu0 %v3572_v1 }
 0x115   : > { %1555 = vperm.xlu1 %3810, %v4186_v51   ;;  %3374 = vmatprep.mubr.msk.f32.mxu0 %vm814_vm1, %v2854_v21  ;;  %v4463_v61 = vpop.permute.xlu0 %690  ;;  %v606_v21 = vld [vmem:[%s5002_s1 + $0x58] sm:$0xff] }
 0x116   : > { %v1493_v45 = vpop.permute.xlu1 %1492  ;;  %v3528_v26 = vpack.c.bf16 %v606_v21, %v605_v0  ;;  %3575 = vmatpush3.bf16.msra.mxu0 %v3572_v1  ;;  %v2968_v21 = vld [vmem:[%s5002_s1 + $0x198] sm:$0xf] }
 0x117   : > { %vm1569_vm8 = vcmp.eq.s32.totalorder %v4289_v10, %v1493_v45  ;;  %v2966_v45 = vld [vmem:[%s5002_s1 + $0x188] sm:$0xff] }
 0x118   : > { %v2855_v4 = vsel %vm1569_vm8, 1.0, %v3884_v50  ;;  %3529 = vmatprep.subr.bf16.mxu1 %v3528_v26 }
 0x119   : > { %3812 = vset.pattern.permute.xlu1 %v3882_v56  ;;  %3375 = vmatmul.mubr.msk.f32.gmra.mrb[8].mxu0 %vm814_vm1, %v2855_v4  ;;  %v4480_v56 = vpop.permute.xlu0 %699  ;;  %v2747_v4 = vsel %vm716_vm10, 1.0, %v3884_v50 }
 0x11a   : > { %702 = vperm.xlu1 %3812, %v4220_v29   ;;  %3377 = vmatprep.mubr.msk.f32.mxu0 %vm814_vm1, %v2856_v14  ;;  %v3576_v14 = vpack.c.bf16 %v2967_v11, %v2966_v45 }
 0x11b   : > { %v640_v3 = vpop.permute.xlu1 %639  ;;  %3531 = vmatpush3.bf16.msra.mxu1 %v3528_v26 }
 0x11c   : > { %vm714_vm9 = vcmp.eq.s32.totalorder %v4289_v10, %v640_v3  ;;  %3286 = vmatprep.subr.msk.mxu1 %vm911_vm0, %v607_v19  ;;  %3577 = vmatprep.subr.bf16.mxu0 %v3576_v14 }
 0x11d   : > { %v2745_v36 = vsel %vm714_vm9, 1.0, %v3884_v50  ;;  %3579 = vmatpush3.bf16.msra.mxu0 %v3576_v14 }
 0x11e   : > { %3813 = vset.pattern.permute.xlu1 %v5013_v5  ;;  %3229 = vmatprep.mubr.msk.f32.mxu1 %vm814_vm1, %v2745_v36 }
 0x11f   : > { %2027 = vperm.xlu1 %3813, %v3972_v63   ;;  %v643_v1 = vpop.permute.xlu1 %642  ;;  %3287 = vmatpush3.msk.msra.mxu1 %vm911_vm0, %v607_v19  ;;  %v1505_v63 = vpop.permute.xlu0 %1504  ;;  %v2750_v19 = vsel %vm719_vm15, 1.0, %v3884_v50 }
 0x120   : > { %vm715_vm11 = vcmp.eq.s32.totalorder %v4289_v10, %v643_v1  ;;  %3434 = vmatprep.subr.msk.mxu0 %vm911_vm0, %v2968_v21  ;;  %vm1573_vm13 = vcmp.eq.s32.totalorder %v4289_v10, %v1505_v63  ;;  %v2753_v63 = vsel %vm722_vm7, 1.0, %v3884_v50 }
 0x121   : > { %v2746_v0 = vsel %vm715_vm11, 1.0, %v3884_v50  ;;  %3435 = vmatpush3.msk.msra.mxu0 %vm911_vm0, %v2968_v21  ;;  %v2859_v36 = vsel %vm1573_vm13, 1.0, %v3884_v50  ;;  %vm725_vm13 = vcmp.eq.s32.totalorder %v4289_v10, %v4420_v35 }
 0x122   : > { %3230 = vmatmul.mubr.msk.f32.gmra.mrb[10].mxu1 %vm814_vm1, %v2746_v0 }
 0x123   : > { %2030 = vperm.xlu1 %3813, %v3979_v7   ;;  %3232 = vmatprep.mubr.msk.f32.mxu1 %vm814_vm1, %v2747_v4  ;;  %v1514_v55 = vpop.permute.xlu0 %1513 }
 0x124   : > { %v1499_v26 = vpop.permute.xlu1 %1498  ;;  %vm1576_vm4 = vcmp.eq.s32.totalorder %v4289_v10, %v1514_v55 }
 0x125   : > { %vm1571_vm12 = vcmp.eq.s32.totalorder %v4289_v10, %v1499_v26 }
 0x126   : > { %v2857_v3 = vsel %vm1571_vm12, 1.0, %v3884_v50 }
 0x127   : > { %2036 = vperm.xlu1 %3813, %v3977_v6   ;;  %3378 = vmatmul.mubr.msk.f32.gmra.mrb[10].mxu0 %vm814_vm1, %v2857_v3  ;;  %v1523_v52 = vpop.permute.xlu0 %1522 }
 0x128   : > { %v1502_v7 = vpop.permute.xlu1 %1501  ;;  %vm1579_vm10 = vcmp.eq.s32.totalorder %v4289_v10, %v1523_v52 }
 0x129   : > { %vm1572_vm14 = vcmp.eq.s32.totalorder %v4289_v10, %v1502_v7  ;;  %v2865_v3 = vsel %vm1579_vm10, 1.0, %v3884_v50  ;;  %vm731_vm10 = vcmp.eq.s32.totalorder %v4289_v10, %v4463_v61 }
 0x12a   : > { %v2858_v45 = vsel %vm1572_vm14, 1.0, %v3884_v50  ;;  %v2762_v52 = vsel %vm731_vm10, 1.0, %v3884_v50 }
 0x12b   : > { %2039 = vperm.xlu1 %3813, %v3985_v22   ;;  %3380 = vmatprep.mubr.msk.f32.mxu0 %vm814_vm1, %v2858_v45  ;;  %v2756_v45 = vsel %vm725_vm13, 1.0, %v3884_v50 }
 0x12c   : > { %3381 = vmatmul.mubr.msk.f32.gmra.mrb[12].mxu0 %vm814_vm1, %v2859_v36 }
 0x12d   : > { %v649_v11 = vpop.permute.xlu1 %648 }
 0x12e   : > { %vm717_vm0 = vcmp.eq.s32.totalorder %v4289_v10, %v649_v11  ;;  %v5014_v11 = vmov 0  }
 0x12f   : > { %v2748_v6 = vsel %vm717_vm0, 1.0, %v3884_v50  ;;  %2045 = vperm.xlu1 %3813, %v3993_v32  }
 0x130   : > { %3233 = vmatmul.mubr.msk.f32.gmra.mrb[12].mxu1 %vm814_vm1, %v2748_v6  ;;  %v1532_v6 = vpop.permute.xlu0 %1531 }
 0x131   : > { %v652_v5 = vpop.permute.xlu1 %651  ;;  %vm1582_vm15 = vcmp.eq.s32.totalorder %v4289_v10, %v1532_v6 }
 0x132   : > { %vm718_vm2 = vcmp.eq.s32.totalorder %v4289_v10, %v652_v5 }
 0x133   : > { %v2749_v22 = vsel %vm718_vm2, 1.0, %v3884_v50  ;;  %2051 = vperm.xlu1 %3813, %v4004_v13   ;;  %v2862_v13 = vsel %vm1576_vm4, 1.0, %v3884_v50  ;;  %vm728_vm4 = vcmp.eq.s32.totalorder %v4289_v10, %v4441_v60 }
 0x134   : > { %3235 = vmatprep.mubr.msk.f32.mxu1 %vm814_vm1, %v2749_v22  ;;  %v1541_v22 = vpop.permute.xlu0 %1540 }
 0x135   : > { %3236 = vmatmul.mubr.msk.f32.gmra.mrb[14].mxu1 %vm814_vm1, %v2750_v19  ;;  %v2868_v19 = vsel %vm1582_vm15, 1.0, %v3884_v50  ;;  %vm1585_vm7 = vcmp.eq.s32.totalorder %v4289_v10, %v1541_v22  ;;  %vm734_vm15 = vcmp.eq.s32.totalorder %v4289_v10, %v4480_v56 }
 0x136   : > { %v1508_v14 = vpop.permute.xlu1 %1507  ;;  %v2765_v6 = vsel %vm734_vm15, 1.0, %v3884_v50  ;;  %vm505_vm15 = vcmp.eq.s32.totalorder %v4289_v10, %v4226_v31 }
 0x137   : > { %vm1574_vm3 = vcmp.eq.s32.totalorder %v4289_v10, %v1508_v14  ;;  %2057 = vperm.xlu1 %3813, %v4011_v20  }
 0x138   : > { %v2860_v32 = vsel %vm1574_vm3, 1.0, %v3884_v50 }
 0x139   : > { %3383 = vmatprep.mubr.msk.f32.mxu0 %vm814_vm1, %v2860_v32 }
 0x13a   : > { %v1511_v1 = vpop.permute.xlu1 %1510 }
 0x13b   : > { %vm1575_vm5 = vcmp.eq.s32.totalorder %v4289_v10, %v1511_v1  ;;  %2063 = vperm.xlu1 %3813, %v4015_v23   ;;  %v2759_v1 = vsel %vm728_vm4, 1.0, %v3884_v50 }
 0x13c   : > { %v2861_v4 = vsel %vm1575_vm5, 1.0, %v3884_v50 }
 0x13d   : > { %3384 = vmatmul.mubr.msk.f32.gmra.mrb[14].mxu0 %vm814_vm1, %v2861_v4  ;;  %v2871_v4 = vsel %vm1585_vm7, 1.0, %v3884_v50 }
 0x13e   : > { %3386 = vmatprep.mubr.msk.f32.mxu0 %vm814_vm1, %v2862_v13 }
 0x13f   : > { %2069 = vperm.xlu1 %3813, %v4025_v49   ;;  %v658_v20 = vpop.permute.xlu1 %657 }
 0x140   : > { %vm720_vm6 = vcmp.eq.s32.totalorder %v4289_v10, %v658_v20 }
 0x141   : > { %v2751_v0 = vsel %vm720_vm6, 1.0, %v3884_v50 }
 0x142   : > { %3238 = vmatprep.mubr.msk.f32.mxu1 %vm814_vm1, %v2751_v0 }
 0x143   : > { %2075 = vperm.xlu1 %3813, %v4035_v37   ;;  %v661_v23 = vpop.permute.xlu1 %660 }
 0x144   : > { %vm721_vm8 = vcmp.eq.s32.totalorder %v4289_v10, %v661_v23 }
 0x145   : > { %v2752_v21 = vsel %vm721_vm8, 1.0, %v3884_v50 }
 0x146   : > { %3239 = vmatmul.mubr.msk.f32.gmra.mrb[16].mxu1 %vm814_vm1, %v2752_v21 }
 0x147   : > { %2081 = vperm.xlu1 %3813, %v4041_v43   ;;  %3241 = vmatprep.mubr.msk.f32.mxu1 %vm814_vm1, %v2753_v63 }
 0x148   : > { %v1517_v49 = vpop.permute.xlu1 %1516 }
 0x149   : > { %vm1577_vm9 = vcmp.eq.s32.totalorder %v4289_v10, %v1517_v49 }
 0x14a   : > { %v2863_v26 = vsel %vm1577_vm9, 1.0, %v3884_v50 }
 0x14b   : > { %2087 = vperm.xlu1 %3813, %v4047_v54   ;;  %3387 = vmatmul.mubr.msk.f32.gmra.mrb[16].mxu0 %vm814_vm1, %v2863_v26 }
 0x14c   : > { %v1520_v37 = vpop.permute.xlu1 %1519 }
 0x14d   : > { %vm1578_vm11 = vcmp.eq.s32.totalorder %v4289_v10, %v1520_v37 }
 0x14e   : > { %v2864_v43 = vsel %vm1578_vm11, 1.0, %v3884_v50 }
 0x14f   : > { %2093 = vperm.xlu1 %3813, %v4059_v2   ;;  %3389 = vmatprep.mubr.msk.f32.mxu0 %vm814_vm1, %v2864_v43 }
 0x150   : > { %3390 = vmatmul.mubr.msk.f32.gmra.mrb[18].mxu0 %vm814_vm1, %v2865_v3 }
 0x151   : > { %v667_v7 = vpop.permute.xlu1 %666 }
 0x152   : > { %vm723_vm12 = vcmp.eq.s32.totalorder %v4289_v10, %v667_v7 }
 0x153   : > { %v2754_v54 = vsel %vm723_vm12, 1.0, %v3884_v50  ;;  %2099 = vperm.xlu1 %3813, %v4077_v27  }
 0x154   : > { %3242 = vmatmul.mubr.msk.f32.gmra.mrb[18].mxu1 %vm814_vm1, %v2754_v54 }
 0x155   : > { %v670_v36 = vpop.permute.xlu1 %669 }
 0x156   : > { %vm724_vm14 = vcmp.eq.s32.totalorder %v4289_v10, %v670_v36 }
 0x157   : > { %v2755_v2 = vsel %vm724_vm14, 1.0, %v3884_v50  ;;  %3815 = vset.pattern.permute.xlu1 %v5014_v11 }
 0x158   : > { %482 = vperm.xlu1 %3815, %v4306_v39   ;;  %3244 = vmatprep.mubr.msk.f32.mxu1 %vm814_vm1, %v2755_v2 }
 0x159   : > { %3245 = vmatmul.mubr.msk.f32.gmra.mrb[20].mxu1 %vm814_vm1, %v2756_v45 }
 0x15a   : > { %v1526_v35 = vpop.permute.xlu1 %1525 }
 0x15b   : > { %vm1580_vm0 = vcmp.eq.s32.totalorder %v4289_v10, %v1526_v35 }
 0x15c   : > { %v2866_v27 = vsel %vm1580_vm0, 1.0, %v3884_v50  ;;  %485 = vperm.xlu1 %3815, %v4181_v46  }
 0x15d   : > { %3392 = vmatprep.mubr.msk.f32.mxu0 %vm814_vm1, %v2866_v27 }
 0x15e   : > { %v1529_v5 = vpop.permute.xlu1 %1528 }
 0x15f   : > { %vm1581_vm2 = vcmp.eq.s32.totalorder %v4289_v10, %v1529_v5 }
 0x160   : > { %v2867_v39 = vsel %vm1581_vm2, 1.0, %v3884_v50  ;;  %488 = vperm.xlu1 %3815, %v4212_v17   ;;  %v1550_v17 = vpop.permute.xlu0 %1549 }
 0x161   : > { %3393 = vmatmul.mubr.msk.f32.gmra.mrb[20].mxu0 %vm814_vm1, %v2867_v39  ;;  %vm1588_vm13 = vcmp.eq.s32.totalorder %v4289_v10, %v1550_v17 }
 0x162   : > { %3395 = vmatprep.mubr.msk.f32.mxu0 %vm814_vm1, %v2868_v19  ;;  %v2874_v43 = vsel %vm1588_vm13, 1.0, %v3884_v50  ;;  %vm503_vm13 = vcmp.eq.s32.totalorder %v4289_v10, %v4217_v25 }
 0x163   : > { %v676_v55 = vpop.permute.xlu1 %675 }
 0x164   : > { %vm726_vm3 = vcmp.eq.s32.totalorder %v4289_v10, %v676_v55  ;;  %491 = vperm.xlu1 %3815, %v4360_v41   ;;  %v1559_v13 = vpop.permute.xlu0 %1558 }
 0x165   : > { %v2757_v46 = vsel %vm726_vm3, 1.0, %v3884_v50  ;;  %vm1591_vm4 = vcmp.eq.s32.totalorder %v4289_v10, %v1559_v13 }
 0x166   : > { %3247 = vmatprep.mubr.msk.f32.mxu1 %vm814_vm1, %v2757_v46  ;;  %v2877_v22 = vsel %vm1591_vm4, 1.0, %v3884_v50  ;;  %vm507_vm4 = vcmp.eq.s32.totalorder %v4289_v10, %v4232_v34 }
 0x167   : > { %v679_v14 = vpop.permute.xlu1 %678 }
 0x168   : > { %vm727_vm5 = vcmp.eq.s32.totalorder %v4289_v10, %v679_v14  ;;  %494 = vperm.xlu1 %3815, %v4186_v51  }
 0x169   : > { %v2758_v32 = vsel %vm727_vm5, 1.0, %v3884_v50 }
 0x16a   : > { %3248 = vmatmul.mubr.msk.f32.gmra.mrb[22].mxu1 %vm814_vm1, %v2758_v32 }
 0x16b   : > { %3250 = vmatprep.mubr.msk.f32.mxu1 %vm814_vm1, %v2759_v1 }
 0x16c   : > { %497 = vperm.xlu1 %3815, %v4220_v29   ;;  %v1535_v41 = vpop.permute.xlu1 %1534  ;;  %v4611_v29 = vpop.permute.xlu0 %2033 }
 0x16d   : > { %vm1583_vm6 = vcmp.eq.s32.totalorder %v4289_v10, %v1535_v41 }
 0x16e   : > { %v2869_v60 = vsel %vm1583_vm6, 1.0, %v3884_v50  ;;  %vm499_vm6 = vcmp.eq.s32.totalorder %v4289_v10, %v4202_v9 }
 0x16f   : > { %3396 = vmatmul.mubr.msk.f32.gmra.mrb[22].mxu0 %vm814_vm1, %v2869_v60  ;;  %v2703_v17 = vsel %vm499_vm6, 1.0, %v3884_v50 }
 0x170   : > { %v1538_v51 = vpop.permute.xlu1 %1537  ;;  %v4619_v21 = vpop.permute.xlu0 %2042 }
 0x171   : > { %vm1584_vm8 = vcmp.eq.s32.totalorder %v4289_v10, %v1538_v51 }
 0x172   : > { %v2870_v20 = vsel %vm1584_vm8, 1.0, %v3884_v50  ;;  %vm500_vm8 = vcmp.eq.s32.totalorder %v4289_v10, %v4209_v16 }
 0x173   : > { %3398 = vmatprep.mubr.msk.f32.mxu0 %vm814_vm1, %v2870_v20  ;;  %v2704_v32 = vsel %vm500_vm8, 1.0, %v3884_v50  ;;  %v2709_v20 = vsel %vm505_vm15, 1.0, %v3884_v50  ;;  %vm509_vm8 = vcmp.eq.s32.totalorder %v4289_v10, %v4239_v40  ;;  %vm513_vm15 = vcmp.eq.s32.totalorder %v4289_v10, %v4251_v47 }
 0x174   : > { %3399 = vmatmul.mubr.msk.f32.gmra.mrb[24].mxu0 %vm814_vm1, %v2871_v4  ;;  %v4628_v37 = vpop.permute.xlu0 %2048  ;;  %v2713_v40 = vsel %vm509_vm8, 1.0, %v3884_v50  ;;  %v2717_v47 = vsel %vm513_vm15, 1.0, %v3884_v50  ;;  %vm516_vm8 = vcmp.eq.s32.totalorder %v4289_v10, %v4256_v48  ;;  %vm520_vm15 = vcmp.eq.s32.totalorder %v4289_v10, %v4270_v12 }
 0x175   : > { %v685_v0 = vpop.permute.xlu1 %684  ;;  %v2724_v12 = vsel %vm520_vm15, 1.0, %v3884_v50 }
 0x176   : > { %vm729_vm9 = vcmp.eq.s32.totalorder %v4289_v10, %v685_v0 }
 0x177   : > { %v2760_v23 = vsel %vm729_vm9, 1.0, %v3884_v50  ;;  %vm501_vm9 = vcmp.eq.s32.totalorder %v4289_v10, %v4200_v8 }
 0x178   : > { %3251 = vmatmul.mubr.msk.f32.gmra.mrb[24].mxu1 %vm814_vm1, %v2760_v23  ;;  %v4636_v54 = vpop.permute.xlu0 %2054  ;;  %v2705_v41 = vsel %vm501_vm9, 1.0, %v3884_v50  ;;  %v2711_v23 = vsel %vm507_vm4, 1.0, %v3884_v50  ;;  %vm2129_vm9 = vcmp.eq.s32.totalorder %v4289_v10, %v4628_v37  ;;  %vm514_vm4 = vcmp.eq.s32.totalorder %v4289_v10, %v4249_v62 }
 0x179   : > { %v688_v63 = vpop.permute.xlu1 %687  ;;  %v2718_v62 = vsel %vm514_vm4, 1.0, %v3884_v50 }
 0x17a   : > { %vm730_vm11 = vcmp.eq.s32.totalorder %v4289_v10, %v688_v63 }
 0x17b   : > { %v2761_v49 = vsel %vm730_vm11, 1.0, %v3884_v50  ;;  %vm502_vm11 = vcmp.eq.s32.totalorder %v4289_v10, %v4207_v15  ;;  %v2707_v15 = vsel %vm503_vm13, 1.0, %v3884_v50  ;;  %vm2131_vm13 = vcmp.eq.s32.totalorder %v4289_v10, %v4636_v54 }
 0x17c   : > { %3253 = vmatprep.mubr.msk.f32.mxu1 %vm814_vm1, %v2761_v49  ;;  %v4644_v11 = vpop.permute.xlu0 %2060  ;;  %v2706_v60 = vsel %vm502_vm11, 1.0, %v3884_v50  ;;  %vm510_vm11 = vcmp.eq.s32.totalorder %v4289_v10, %v4236_v38 }
 0x17d   : > { %3254 = vmatmul.mubr.msk.f32.gmra.mrb[26].mxu1 %vm814_vm1, %v2762_v52  ;;  %v2931_v52 = vsel %vm2129_vm9, 1.0, %v3884_v50  ;;  %vm517_vm9 = vcmp.eq.s32.totalorder %v4289_v10, %v4265_v53 }
 0x17e   : > { %v1544_v26 = vpop.permute.xlu1 %1543  ;;  %v2721_v53 = vsel %vm517_vm9, 1.0, %v3884_v50 }
 0x17f   : > { %vm1586_vm12 = vcmp.eq.s32.totalorder %v4289_v10, %v1544_v26 }
 0x180   : > { %v2872_v61 = vsel %vm1586_vm12, 1.0, %v3884_v50  ;;  %v4652_v19 = vpop.permute.xlu0 %2066  ;;  %vm2124_vm12 = vcmp.eq.s32.totalorder %v4289_v10, %v4611_v29 }
 0x181   : > { %3401 = vmatprep.mubr.msk.f32.mxu0 %vm814_vm1, %v2872_v61  ;;  %v2926_v13 = vsel %vm2124_vm12, 1.0, %v3884_v50  ;;  %vm511_vm12 = vcmp.eq.s32.totalorder %v4289_v10, %v4245_v44  ;;  %v2714_v61 = vsel %vm510_vm11, 1.0, %v3884_v50 }
 0x182   : > { %v1547_v3 = vpop.permute.xlu1 %1546  ;;  %v2715_v44 = vsel %vm511_vm12, 1.0, %v3884_v50  ;;  %vm518_vm12 = vcmp.eq.s32.totalorder %v4289_v10, %v4263_v28 }
 0x183   : > { %vm1587_vm14 = vcmp.eq.s32.totalorder %v4289_v10, %v1547_v3  ;;  %v2933_v3 = vsel %vm2131_vm13, 1.0, %v3884_v50  ;;  %vm519_vm13 = vcmp.eq.s32.totalorder %v4289_v10, %v4272_v57  ;;  %v2722_v28 = vsel %vm518_vm12, 1.0, %v3884_v50 }
 0x184   : > { %v2873_v7 = vsel %vm1587_vm14, 1.0, %v3884_v50  ;;  %v4663_v55 = vpop.permute.xlu0 %2072  ;;  %v2723_v57 = vsel %vm519_vm13, 1.0, %v3884_v50 }
 0x185   : > { %3402 = vmatmul.mubr.msk.f32.gmra.mrb[26].mxu0 %vm814_vm1, %v2873_v7 }
 0x186   : > { %3404 = vmatprep.mubr.msk.f32.mxu0 %vm814_vm1, %v2874_v43 }
 0x187   : > { %v694_v36 = vpop.permute.xlu1 %693 }
 0x188   : > { %vm732_vm0 = vcmp.eq.s32.totalorder %v4289_v10, %v694_v36  ;;  %v4675_v1 = vpop.permute.xlu0 %2078 }
 0x189   : > { %v2763_v45 = vsel %vm732_vm0, 1.0, %v3884_v50  ;;  %vm504_vm0 = vcmp.eq.s32.totalorder %v4289_v10, %v4215_v24 }
 0x18a   : > { %3256 = vmatprep.mubr.msk.f32.mxu1 %vm814_vm1, %v2763_v45  ;;  %v2708_v24 = vsel %vm504_vm0, 1.0, %v3884_v50  ;;  %vm512_vm0 = vcmp.eq.s32.totalorder %v4289_v10, %v4243_v42 }
 0x18b   : > { %v697_v2 = vpop.permute.xlu1 %696  ;;  %v2716_v42 = vsel %vm512_vm0, 1.0, %v3884_v50 }
 0x18c   : > { %vm733_vm2 = vcmp.eq.s32.totalorder %v4289_v10, %v697_v2  ;;  %v4699_v25 = vpop.permute.xlu0 %2084 }
 0x18d   : > { %v2764_v35 = vsel %vm733_vm2, 1.0, %v3884_v50 }
 0x18e   : > { %3257 = vmatmul.mubr.msk.f32.gmra.mrb[28].mxu1 %vm814_vm1, %v2764_v35 }
 0x18f   : > { %3259 = vmatprep.mubr.msk.f32.mxu1 %vm814_vm1, %v2765_v6  ;;  %v2720_v6 = vsel %vm516_vm8, 1.0, %v3884_v50 }
 0x190   : > { %v1553_v27 = vpop.permute.xlu1 %1552 }
 0x191   : > { %vm1589_vm3 = vcmp.eq.s32.totalorder %v4289_v10, %v1553_v27 }
 0x192   : > { %v2875_v5 = vsel %vm1589_vm3, 1.0, %v3884_v50  ;;  %vm506_vm3 = vcmp.eq.s32.totalorder %v4289_v10, %v4223_v30  ;;  %v4718_v30 = vpop.permute.xlu0 %2090 }
 0x193   : > { %3405 = vmatmul.mubr.msk.f32.gmra.mrb[28].mxu0 %vm814_vm1, %v2875_v5  ;;  %v2710_v0 = vsel %vm506_vm3, 1.0, %v3884_v50 }
 0x194   : > { %v1556_v56 = vpop.permute.xlu1 %1555 }
 0x195   : > { %vm1590_vm5 = vcmp.eq.s32.totalorder %v4289_v10, %v1556_v56 }
 0x196   : > { %v2876_v39 = vsel %vm1590_vm5, 1.0, %v3884_v50  ;;  %vm2127_vm5 = vcmp.eq.s32.totalorder %v4289_v10, %v4619_v21  ;;  %v4744_v26 = vpop.permute.xlu0 %2096 }
 0x197   : > { %3407 = vmatprep.mubr.msk.f32.mxu0 %vm814_vm1, %v2876_v39  ;;  %v2929_v63 = vsel %vm2127_vm5, 1.0, %v3884_v50  ;;  %vm515_vm5 = vcmp.eq.s32.totalorder %v4289_v10, %v4258_v18 }
 0x198   : > { %3408 = vmatmul.mubr.msk.f32.gmra.mrb[30].mxu0 %vm814_vm1, %v2877_v22  ;;  %v2719_v18 = vsel %vm515_vm5, 1.0, %v3884_v50  ;;  %vm522_vm5 = vcmp.eq.s32.totalorder %v4289_v10, %v4276_v58 }
 0x199   : > { %v703_v46 = vpop.permute.xlu1 %702 }
 0x19a   : > { %vm735_vm7 = vcmp.eq.s32.totalorder %v4289_v10, %v703_v46  ;;  %v4767_v7 = vpop.permute.xlu0 %2102 }
 0x19b   : > { %v2766_v14 = vsel %vm735_vm7, 1.0, %v3884_v50  ;;  %vm508_vm7 = vcmp.eq.s32.totalorder %v4289_v10, %v4229_v33  ;;  %vm2147_vm12 = vcmp.eq.s32.totalorder %v4289_v10, %v4767_v7 }
 0x19c   : > { %3260 = vmatmul.mubr.msk.f32.gmra.mrb[30].mxu1 %vm814_vm1, %v2766_v14  ;;  %v2712_v33 = vsel %vm508_vm7, 1.0, %v3884_v50  ;;  %v5015_v14 = vld [vmem:[#allocation6_spill] sm:$0xff] }
 0x19d   : > { %3288 = vmatprep.mubr.msk.f32.mxu1 %vm814_vm1, %v2703_v17 }
 0x19e   : > { %v2028_v9 = vpop.permute.xlu1 %2027  ;;  %v4793_v35 = vpop.permute.xlu0 %2105 }
 0x19f   : > { %vm2122_vm10 = vcmp.eq.s32.totalorder %v4289_v10, %v2028_v9  ;;  %vm2148_vm13 = vcmp.eq.s32.totalorder %v4289_v10, %v4793_v35 }
 0x1a0   : > { %v2924_v16 = vsel %vm2122_vm10, 1.0, %v3884_v50  ;;  %3289 = vmatmul.mubr.msk.f32.vlgmr.msra.gmra.mrb[0].mxu1 %vm814_vm1, %v2704_v32  ;;  %v2726_v32 = vsel %vm522_vm5, 1.0, %v3884_v50 }
 0x1a1   : > { %3291 = vmatprep.mubr.msk.f32.mxu1 %vm814_vm1, %v2705_v41  ;;  %3436 = vmatprep.mubr.msk.f32.mxu0 %vm814_vm1, %v2924_v16 }
 0x1a2   : > { %v2031_v8 = vpop.permute.xlu1 %2030  ;;  %v4816_v56 = vpop.permute.xlu0 %2108 }
 0x1a3   : > { %vm2123_vm14 = vcmp.eq.s32.totalorder %v4289_v10, %v2031_v8 }
 0x1a4   : > { %v2925_v51 = vsel %vm2123_vm14, 1.0, %v3884_v50  ;;  %3292 = vmatmul.mubr.msk.f32.gmra.mrb[2].mxu1 %vm814_vm1, %v2706_v60 }
 0x1a5   : > { %3294 = vmatprep.mubr.msk.f32.mxu1 %vm814_vm1, %v2707_v15  ;;  %3437 = vmatmul.mubr.msk.f32.vlgmr.msra.gmra.mrb[0].mxu0 %vm814_vm1, %v2925_v51 }
 0x1a6   : > { %v2037_v4 = vpop.permute.xlu1 %2036  ;;  %3439 = vmatprep.mubr.msk.f32.mxu0 %vm814_vm1, %v2926_v13  ;;  %v2112_v9 = vpop.permute.xlu0 %2111 }
 0x1a7   : > { %vm2125_vm2 = vcmp.eq.s32.totalorder %v4289_v10, %v2037_v4  ;;  %vm2150_vm15 = vcmp.eq.s32.totalorder %v4289_v10, %v2112_v9 }
 0x1a8   : > { %v2927_v31 = vsel %vm2125_vm2, 1.0, %v3884_v50  ;;  %3295 = vmatmul.mubr.msk.f32.gmra.mrb[4].mxu1 %vm814_vm1, %v2708_v24  ;;  %vm2133_vm2 = vcmp.eq.s32.totalorder %v4289_v10, %v4644_v11 }
 0x1a9   : > { %3297 = vmatprep.mubr.msk.f32.mxu1 %vm814_vm1, %v2709_v20  ;;  %3440 = vmatmul.mubr.msk.f32.gmra.mrb[2].mxu0 %vm814_vm1, %v2927_v31  ;;  %v2935_v36 = vsel %vm2133_vm2, 1.0, %v3884_v50  ;;  %vm521_vm2 = vcmp.eq.s32.totalorder %v4289_v10, %v4278_v59  ;;  %v2949_v20 = vsel %vm2147_vm12, 1.0, %v3884_v50 }
 0x1aa   : > { %v2040_v29 = vpop.permute.xlu1 %2039  ;;  %v2725_v59 = vsel %vm521_vm2, 1.0, %v3884_v50  ;;  %v2115_v15 = vpop.permute.xlu0 %2114 }
 0x1ab   : > { %vm2126_vm6 = vcmp.eq.s32.totalorder %v4289_v10, %v2040_v29  ;;  %v2950_v29 = vsel %vm2148_vm13, 1.0, %v3884_v50 }
 0x1ac   : > { %v2928_v34 = vsel %vm2126_vm6, 1.0, %v3884_v50  ;;  %3298 = vmatmul.mubr.msk.f32.gmra.mrb[6].mxu1 %vm814_vm1, %v2710_v0  ;;  %vm2135_vm6 = vcmp.eq.s32.totalorder %v4289_v10, %v4652_v19 }
 0x1ad   : > { %3300 = vmatprep.mubr.msk.f32.mxu1 %vm814_vm1, %v2711_v23  ;;  %3442 = vmatprep.mubr.msk.f32.mxu0 %vm814_vm1, %v2928_v34  ;;  %v2937_v11 = vsel %vm2135_vm6, 1.0, %v3884_v50  ;;  %vm523_vm6 = vcmp.eq.s32.totalorder %v4289_v10, %v5015_v14  ;;  %v2952_v34 = vsel %vm2150_vm15, 1.0, %v3884_v50 }
 0x1ae   : > { %v2046_v21 = vpop.permute.xlu1 %2045  ;;  %3443 = vmatmul.mubr.msk.f32.gmra.mrb[4].mxu0 %vm814_vm1, %v2929_v63  ;;  %v2727_v41 = vsel %vm523_vm6, 1.0, %v3884_v50  ;;  %v2118_v31 = vpop.permute.xlu0 %2117 }
 0x1af   : > { %vm2128_vm10 = vcmp.eq.s32.totalorder %v4289_v10, %v2046_v21 }
 0x1b0   : > { %v2930_v49 = vsel %vm2128_vm10, 1.0, %v3884_v50  ;;  %3301 = vmatmul.mubr.msk.f32.gmra.mrb[8].mxu1 %vm814_vm1, %v2712_v33  ;;  %vm2137_vm10 = vcmp.eq.s32.totalorder %v4289_v10, %v4663_v55 }
 0x1b1   : > { %3303 = vmatprep.mubr.msk.f32.mxu1 %vm814_vm1, %v2713_v40  ;;  %3445 = vmatprep.mubr.msk.f32.mxu0 %vm814_vm1, %v2930_v49  ;;  %v2939_v5 = vsel %vm2137_vm10, 1.0, %v3884_v50  ;;  %vm2145_vm10 = vcmp.eq.s32.totalorder %v4289_v10, %v4744_v26 }
 0x1b2   : > { %v2052_v38 = vpop.permute.xlu1 %2051  ;;  %3446 = vmatmul.mubr.msk.f32.gmra.mrb[6].mxu0 %vm814_vm1, %v2931_v52  ;;  %v2121_v63 = vpop.permute.xlu0 %2120 }
 0x1b3   : > { %vm2130_vm14 = vcmp.eq.s32.totalorder %v4289_v10, %v2052_v38  ;;  %vm2153_vm6 = vcmp.eq.s32.totalorder %v4289_v10, %v2121_v63 }
 0x1b4   : > { %v2932_v37 = vsel %vm2130_vm14, 1.0, %v3884_v50  ;;  %3304 = vmatmul.mubr.msk.f32.gmra.mrb[10].mxu1 %vm814_vm1, %v2714_v61  ;;  %vm2139_vm14 = vcmp.eq.s32.totalorder %v4289_v10, %v4675_v1  ;;  %v5016_v1 = vld [vmem:[#allocation5_spill] sm:$0xff]  ;;  %v2955_v26 = vsel %vm2153_vm6, 1.0, %v3884_v50 }
 0x1b5   : > { %3306 = vmatprep.mubr.msk.f32.mxu1 %vm814_vm1, %v2715_v44  ;;  %3448 = vmatprep.mubr.msk.f32.mxu0 %vm814_vm1, %v2932_v37  ;;  %v2941_v22 = vsel %vm2139_vm14, 1.0, %v3884_v50  ;;  %vm524_vm9 = vcmp.eq.s32.totalorder %v4289_v10, %v5016_v1 }
 0x1b6   : > { %v2058_v43 = vpop.permute.xlu1 %2057  ;;  %3449 = vmatmul.mubr.msk.f32.gmra.mrb[8].mxu0 %vm814_vm1, %v2933_v3  ;;  %v2728_v13 = vsel %vm524_vm9, 1.0, %v3884_v50 }
 0x1b7   : > { %vm2132_vm3 = vcmp.eq.s32.totalorder %v4289_v10, %v2058_v43 }
 0x1b8   : > { %v2934_v54 = vsel %vm2132_vm3, 1.0, %v3884_v50  ;;  %3307 = vmatmul.mubr.msk.f32.gmra.mrb[12].mxu1 %vm814_vm1, %v2716_v42  ;;  %vm2141_vm3 = vcmp.eq.s32.totalorder %v4289_v10, %v4699_v25  ;;  %v2947_v25 = vsel %vm2145_vm10, 1.0, %v3884_v50 }
 0x1b9   : > { %3309 = vmatprep.mubr.msk.f32.mxu1 %vm814_vm1, %v2717_v47  ;;  %3451 = vmatprep.mubr.msk.f32.mxu0 %vm814_vm1, %v2934_v54  ;;  %v2943_v17 = vsel %vm2141_vm3, 1.0, %v3884_v50  ;;  %vm2151_vm3 = vcmp.eq.s32.totalorder %v4289_v10, %v2115_v15 }
 0x1ba   : > { %v2064_v45 = vpop.permute.xlu1 %2063  ;;  %3452 = vmatmul.mubr.msk.f32.gmra.mrb[10].mxu0 %vm814_vm1, %v2935_v36  ;;  %v2953_v33 = vsel %vm2151_vm3, 1.0, %v3884_v50 }
 0x1bb   : > { %vm2134_vm7 = vcmp.eq.s32.totalorder %v4289_v10, %v2064_v45 }
 0x1bc   : > { %v2936_v2 = vsel %vm2134_vm7, 1.0, %v3884_v50  ;;  %3310 = vmatmul.mubr.msk.f32.gmra.mrb[14].mxu1 %vm814_vm1, %v2718_v62  ;;  %vm2143_vm7 = vcmp.eq.s32.totalorder %v4289_v10, %v4718_v30 }
 0x1bd   : > { %3312 = vmatprep.mubr.msk.f32.mxu1 %vm814_vm1, %v2719_v18  ;;  %3454 = vmatprep.mubr.msk.f32.mxu0 %vm814_vm1, %v2936_v2  ;;  %v2945_v8 = vsel %vm2143_vm7, 1.0, %v3884_v50 }
 0x1be   : > { %v2070_v48 = vpop.permute.xlu1 %2069  ;;  %3455 = vmatmul.mubr.msk.f32.gmra.mrb[12].mxu0 %vm814_vm1, %v2937_v11 }
 0x1bf   : > { %vm2136_vm11 = vcmp.eq.s32.totalorder %v4289_v10, %v2070_v48 }
 0x1c0   : > { %v2938_v27 = vsel %vm2136_vm11, 1.0, %v3884_v50  ;;  %3313 = vmatmul.mubr.msk.f32.gmra.mrb[16].mxu1 %vm814_vm1, %v2720_v6 }
 0x1c1   : > { %3315 = vmatprep.mubr.msk.f32.mxu1 %vm814_vm1, %v2721_v53  ;;  %3457 = vmatprep.mubr.msk.f32.mxu0 %vm814_vm1, %v2938_v27 }
 0x1c2   : > { %v2076_v19 = vpop.permute.xlu1 %2075  ;;  %3458 = vmatmul.mubr.msk.f32.gmra.mrb[14].mxu0 %vm814_vm1, %v2939_v5 }
 0x1c3   : > { %vm2138_vm0 = vcmp.eq.s32.totalorder %v4289_v10, %v2076_v19 }
 0x1c4   : > { %v2940_v39 = vsel %vm2138_vm0, 1.0, %v3884_v50  ;;  %3316 = vmatmul.mubr.msk.f32.gmra.mrb[18].mxu1 %vm814_vm1, %v2722_v28  ;;  %vm2149_vm0 = vcmp.eq.s32.totalorder %v4289_v10, %v4816_v56 }
 0x1c5   : > { %3318 = vmatprep.mubr.msk.f32.mxu1 %vm814_vm1, %v2723_v57  ;;  %3460 = vmatprep.mubr.msk.f32.mxu0 %vm814_vm1, %v2940_v39  ;;  %v2951_v30 = vsel %vm2149_vm0, 1.0, %v3884_v50 }
 0x1c6   : > { %v2082_v55 = vpop.permute.xlu1 %2081  ;;  %3461 = vmatmul.mubr.msk.f32.gmra.mrb[16].mxu0 %vm814_vm1, %v2941_v22 }
 0x1c7   : > { %vm2140_vm4 = vcmp.eq.s32.totalorder %v4289_v10, %v2082_v55 }
 0x1c8   : > { %v2942_v46 = vsel %vm2140_vm4, 1.0, %v3884_v50  ;;  %3319 = vmatmul.mubr.msk.f32.gmra.mrb[20].mxu1 %vm814_vm1, %v2724_v12  ;;  %vm2152_vm4 = vcmp.eq.s32.totalorder %v4289_v10, %v2118_v31 }
 0x1c9   : > { %3321 = vmatprep.mubr.msk.f32.mxu1 %vm814_vm1, %v2725_v59  ;;  %3463 = vmatprep.mubr.msk.f32.mxu0 %vm814_vm1, %v2942_v46  ;;  %v2954_v49 = vsel %vm2152_vm4, 1.0, %v3884_v50 }
 0x1ca   : > { %v2088_v58 = vpop.permute.xlu1 %2087  ;;  %3464 = vmatmul.mubr.msk.f32.gmra.mrb[18].mxu0 %vm814_vm1, %v2943_v17 }
 0x1cb   : > { %vm2142_vm8 = vcmp.eq.s32.totalorder %v4289_v10, %v2088_v58 }
 0x1cc   : > { %v2944_v16 = vsel %vm2142_vm8, 1.0, %v3884_v50  ;;  %3322 = vmatmul.mubr.msk.f32.gmra.mrb[22].mxu1 %vm814_vm1, %v2726_v32 }
 0x1cd   : > { %3324 = vmatprep.mubr.msk.f32.mxu1 %vm814_vm1, %v2727_v41  ;;  %3466 = vmatprep.mubr.msk.f32.mxu0 %vm814_vm1, %v2944_v16 }
 0x1ce   : > { %v2094_v60 = vpop.permute.xlu1 %2093  ;;  %3467 = vmatmul.mubr.msk.f32.gmra.mrb[20].mxu0 %vm814_vm1, %v2945_v8 }
 0x1cf   : > { %vm2144_vm11 = vcmp.eq.s32.totalorder %v4289_v10, %v2094_v60 }
 0x1d0   : > { %v2946_v51 = vsel %vm2144_vm11, 1.0, %v3884_v50  ;;  %3325 = vmatmul.mubr.msk.f32.gmra.mrb[24].mxu1 %vm814_vm1, %v2728_v13 }
 0x1d1   : > { %3469 = vmatprep.mubr.msk.f32.mxu0 %vm814_vm1, %v2946_v51 }
 0x1d2   : > { %v2100_v4 = vpop.permute.xlu1 %2099  ;;  %3470 = vmatmul.mubr.msk.f32.gmra.mrb[22].mxu0 %vm814_vm1, %v2947_v25 }
 0x1d3   : > { %vm2146_vm14 = vcmp.eq.s32.totalorder %v4289_v10, %v2100_v4 }
 0x1d4   : > { %v2948_v24 = vsel %vm2146_vm14, 1.0, %v3884_v50 }
 0x1d5   : > { %3472 = vmatprep.mubr.msk.f32.mxu0 %vm814_vm1, %v2948_v24 }
 0x1d6   : > { %3473 = vmatmul.mubr.msk.f32.gmra.mrb[24].mxu0 %vm814_vm1, %v2949_v20 }
 0x1d7   : > { %v483_v0 = vpop.permute.xlu1 %482  ;;  %3475 = vmatprep.mubr.msk.f32.mxu0 %vm814_vm1, %v2950_v29 }
 0x1d8   : > { %vm525_vm2 = vcmp.eq.s32.totalorder %v4289_v10, %v483_v0 }
 0x1d9   : > { %v2729_v23 = vsel %vm525_vm2, 1.0, %v3884_v50 }
 0x1da   : > { %3327 = vmatprep.mubr.msk.f32.mxu1 %vm814_vm1, %v2729_v23  ;;  %3476 = vmatmul.mubr.msk.f32.gmra.mrb[26].mxu0 %vm814_vm1, %v2951_v30 }
 0x1db   : > { %v486_v21 = vpop.permute.xlu1 %485  ;;  %3478 = vmatprep.mubr.msk.f32.mxu0 %vm814_vm1, %v2952_v34 }
 0x1dc   : > { %vm526_vm5 = vcmp.eq.s32.totalorder %v4289_v10, %v486_v21 }
 0x1dd   : > { %v2730_v40 = vsel %vm526_vm5, 1.0, %v3884_v50 }
 0x1de   : > { %3328 = vmatmul.mubr.msk.f32.gmra.mrb[26].mxu1 %vm814_vm1, %v2730_v40  ;;  %3479 = vmatmul.mubr.msk.f32.gmra.mrb[28].mxu0 %vm814_vm1, %v2953_v33 }
 0x1df   : > { %v489_v52 = vpop.permute.xlu1 %488  ;;  %3481 = vmatprep.mubr.msk.f32.mxu0 %vm814_vm1, %v2954_v49 }
 0x1e0   : > { %vm527_vm7 = vcmp.eq.s32.totalorder %v4289_v10, %v489_v52 }
 0x1e1   : > { %v2731_v38 = vsel %vm527_vm7, 1.0, %v3884_v50 }
 0x1e2   : > { %3330 = vmatprep.mubr.msk.f32.mxu1 %vm814_vm1, %v2731_v38  ;;  %3482 = vmatmul.mubr.msk.f32.gmra.mrb[30].mxu0 %vm814_vm1, %v2955_v26 }
 0x1e3   : > { %v492_v61 = vpop.permute.xlu1 %491 }
 0x1e4   : > { %vm528_vm8 = vcmp.eq.s32.totalorder %v4289_v10, %v492_v61 }
 0x1e5   : > { %v2732_v44 = vsel %vm528_vm8, 1.0, %v3884_v50 }
 0x1e6   : > { %3331 = vmatmul.mubr.msk.f32.gmra.mrb[28].mxu1 %vm814_vm1, %v2732_v44 }
 0x1e7   : > { %v495_v37 = vpop.permute.xlu1 %494 }
 0x1e8   : > { %vm529_vm9 = vcmp.eq.s32.totalorder %v4289_v10, %v495_v37 }
 0x1e9   : > { %v2733_v3 = vsel %vm529_vm9, 1.0, %v3884_v50 }
 0x1ea   : > { %3333 = vmatprep.mubr.msk.f32.mxu1 %vm814_vm1, %v2733_v3 }
 0x1eb   : > { %v498_v43 = vpop.permute.xlu1 %497 }
 0x1ec   : > { %vm530_vm10 = vcmp.eq.s32.totalorder %v4289_v10, %v498_v43 }
 0x1ed   : > { %v2734_v42 = vsel %vm530_vm10, 1.0, %v3884_v50 }
 0x1ee   : > { %3334 = vmatmul.mubr.msk.f32.gmra.mrb[30].mxu1 %vm814_vm1, %v2734_v42 }
 0x273   : > { %v3290_v7 = vpop.f32.mrb[0].mxu1 }
 0x274   : > { %v1305_v47 = vpop.f32.mrb[1].mxu1 }
 0x277   : > { %v3293_v54 = vpop.f32.mrb[2].mxu1 }
 0x278   : > { %v1315_v36 = vpop.f32.mrb[3].mxu1  ;;  %v3438_v45 = vpop.f32.mrb[0].mxu0 }
 0x279   : > { %v3580_v62 = vadd.f32 %v3438_v45, %v3290_v7  ;;  %v2397_v18 = vpop.f32.mrb[1].mxu0 }
 0x27a   : > { %v3581_v2 = vadd.f32 %v2397_v18, %v1305_v47 }
 0x27b   : > { %2589 = vst [vmem:[%s4915_s17 + $0x8] sm:$0xff] %v3580_v62  ;;  %v3296_v10 = vpop.f32.mrb[4].mxu1 }
 0x27c   : > { %2588 = vst [vmem:[%s4915_s17] sm:$0xff] %v3581_v2  ;;  %v1325_v50 = vpop.f32.mrb[5].mxu1  ;;  %v3441_v11 = vpop.f32.mrb[2].mxu0 }
 0x27d   : > { %v3582_v35 = vadd.f32 %v3441_v11, %v3293_v54  ;;  %v2407_v48 = vpop.f32.mrb[3].mxu0 }
 0x27e   : > { %v3583_v6 = vadd.f32 %v2407_v48, %v1315_v36 }
 0x27f   : > { %2591 = vst [vmem:[%s4915_s17 + $0x18] sm:$0xff] %v3582_v35  ;;  %v3299_v53 = vpop.f32.mrb[6].mxu1 }
 0x280   : > { %2590 = vst [vmem:[%s4915_s17 + $0x10] sm:$0xff] %v3583_v6  ;;  %v1335_v27 = vpop.f32.mrb[7].mxu1 }
 0x281   : > { %v3444_v5 = vpop.f32.mrb[4].mxu0 }
 0x282   : > { %v3584_v19 = vadd.f32 %v3444_v5, %v3296_v10  ;;  %v2417_v28 = vpop.f32.mrb[5].mxu0 }
 0x283   : > { %v3585_v56 = vadd.f32 %v2417_v28, %v1325_v50  ;;  %v3302_v57 = vpop.f32.mrb[8].mxu1 }
 0x284   : > { %2593 = vst [vmem:[%s4915_s17 + $0x28] sm:$0xff] %v3584_v19  ;;  %v1345_v39 = vpop.f32.mrb[9].mxu1 }
 0x285   : > { %2592 = vst [vmem:[%s4915_s17 + $0x20] sm:$0xff] %v3585_v56  ;;  %v3447_v22 = vpop.f32.mrb[6].mxu0 }
 0x286   : > { %v3586_v55 = vadd.f32 %v3447_v22, %v3299_v53  ;;  %v2427_v12 = vpop.f32.mrb[7].mxu0 }
 0x287   : > { %v3587_v59 = vadd.f32 %v2427_v12, %v1335_v27  ;;  %v3305_v46 = vpop.f32.mrb[10].mxu1 }
 0x288   : > { %2595 = vst [vmem:[%s4915_s17 + $0x38] sm:$0xff] %v3586_v55  ;;  %v1355_v14 = vpop.f32.mrb[11].mxu1 }
 0x289   : > { %2594 = vst [vmem:[%s4915_s17 + $0x30] sm:$0xff] %v3587_v59  ;;  %v3450_v17 = vpop.f32.mrb[8].mxu0 }
 0x28a   : > { %v3588_v9 = vadd.f32 %v3450_v17, %v3302_v57  ;;  %v2437_v58 = vpop.f32.mrb[9].mxu0 }
 0x28b   : > { %v3589_v32 = vadd.f32 %v2437_v58, %v1345_v39  ;;  %v3308_v1 = vpop.f32.mrb[12].mxu1 }
 0x28c   : > { %2597 = vst [vmem:[%s4915_s17 + $0x48] sm:$0xff] %v3588_v9  ;;  %v1365_v41 = vpop.f32.mrb[13].mxu1 }
 0x28d   : > { %2596 = vst [vmem:[%s4915_s17 + $0x40] sm:$0xff] %v3589_v32  ;;  %v3453_v16 = vpop.f32.mrb[10].mxu0 }
 0x28e   : > { %v3590_v8 = vadd.f32 %v3453_v16, %v3305_v46  ;;  %v2447_v60 = vpop.f32.mrb[11].mxu0 }
 0x28f   : > { %v3591_v13 = vadd.f32 %v2447_v60, %v1355_v14  ;;  %v3311_v15 = vpop.f32.mrb[14].mxu1 }
 0x290   : > { %2599 = vst [vmem:[%s4915_s17 + $0x58] sm:$0xff] %v3590_v8  ;;  %v1375_v51 = vpop.f32.mrb[15].mxu1 }
 0x291   : > { %2598 = vst [vmem:[%s4915_s17 + $0x50] sm:$0xff] %v3591_v13  ;;  %v3456_v25 = vpop.f32.mrb[12].mxu0 }
 0x292   : > { %v3592_v4 = vadd.f32 %v3456_v25, %v3308_v1  ;;  %v2457_v24 = vpop.f32.mrb[13].mxu0 }
 0x293   : > { %v3593_v20 = vadd.f32 %v2457_v24, %v1365_v41  ;;  %v3314_v31 = vpop.f32.mrb[16].mxu1 }
 0x294   : > { %2601 = vst [vmem:[%s4915_s17 + $0x68] sm:$0xff] %v3592_v4  ;;  %v1385_v29 = vpop.f32.mrb[17].mxu1 }
 0x295   : > { %2600 = vst [vmem:[%s4915_s17 + $0x60] sm:$0xff] %v3593_v20  ;;  %v3459_v0 = vpop.f32.mrb[14].mxu0 }
 0x296   : > { %v3594_v30 = vadd.f32 %v3459_v0, %v3311_v15  ;;  %v2467_v23 = vpop.f32.mrb[15].mxu0 }
 0x297   : > { %v3595_v34 = vadd.f32 %v2467_v23, %v1375_v51  ;;  %v3317_v63 = vpop.f32.mrb[18].mxu1 }
 0x298   : > { %2603 = vst [vmem:[%s4915_s17 + $0x78] sm:$0xff] %v3594_v30  ;;  %v1395_v21 = vpop.f32.mrb[19].mxu1 }
 0x299   : > { %2602 = vst [vmem:[%s4915_s17 + $0x70] sm:$0xff] %v3595_v34  ;;  %v3462_v33 = vpop.f32.mrb[16].mxu0 }
 0x29a   : > { %v3596_v40 = vadd.f32 %v3462_v33, %v3314_v31  ;;  %v2477_v49 = vpop.f32.mrb[17].mxu0 }
 0x29b   : > { %v3597_v52 = vadd.f32 %v2477_v49, %v1385_v29  ;;  %v3320_v26 = vpop.f32.mrb[20].mxu1 }
 0x29c   : > { %2605 = vst [vmem:[%s4915_s17 + $0x88] sm:$0xff] %v3596_v40  ;;  %v1405_v38 = vpop.f32.mrb[21].mxu1 }
 0x29d   : > { %2604 = vst [vmem:[%s4915_s17 + $0x80] sm:$0xff] %v3597_v52  ;;  %v3465_v61 = vpop.f32.mrb[18].mxu0 }
 0x29e   : > { %v3598_v44 = vadd.f32 %v3465_v61, %v3317_v63  ;;  %v2487_v37 = vpop.f32.mrb[19].mxu0 }
 0x29f   : > { %v3599_v3 = vadd.f32 %v2487_v37, %v1395_v21  ;;  %v3323_v43 = vpop.f32.mrb[22].mxu1 }
 0x2a0   : > { %2607 = vst [vmem:[%s4915_s17 + $0x98] sm:$0xff] %v3598_v44  ;;  %v1415_v42 = vpop.f32.mrb[23].mxu1 }
 0x2a1   : > { %2606 = vst [vmem:[%s4915_s17 + $0x90] sm:$0xff] %v3599_v3  ;;  %v3468_v7 = vpop.f32.mrb[20].mxu0 }
 0x2a2   : > { %v3600_v47 = vadd.f32 %v3468_v7, %v3320_v26  ;;  %v2497_v54 = vpop.f32.mrb[21].mxu0 }
 0x2a3   : > { %v3601_v36 = vadd.f32 %v2497_v54, %v1405_v38  ;;  %v3326_v45 = vpop.f32.mrb[24].mxu1 }
 0x2a4   : > { %2609 = vst [vmem:[%s4915_s17 + $0xa8] sm:$0xff] %v3600_v47  ;;  %v1425_v62 = vpop.f32.mrb[25].mxu1 }
 0x2a5   : > { %2608 = vst [vmem:[%s4915_s17 + $0xa0] sm:$0xff] %v3601_v36  ;;  %v3471_v18 = vpop.f32.mrb[22].mxu0 }
 0x2a6   : > { %v3602_v2 = vadd.f32 %v3471_v18, %v3323_v43  ;;  %v2507_v10 = vpop.f32.mrb[23].mxu0 }
 0x2a7   : > { %v3603_v50 = vadd.f32 %v2507_v10, %v1415_v42 }
 0x2a8   : > { %2611 = vst [vmem:[%s4915_s17 + $0xb8] sm:$0xff] %v3602_v2 }
 0x2a9   : > { %2610 = vst [vmem:[%s4915_s17 + $0xb0] sm:$0xff] %v3603_v50  ;;  %v3474_v11 = vpop.f32.mrb[24].mxu0 }
 0x2aa   : > { %v3604_v35 = vadd.f32 %v3474_v11, %v3326_v45  ;;  %v2517_v48 = vpop.f32.mrb[25].mxu0 }
 0x2ab   : > { %v3605_v6 = vadd.f32 %v2517_v48, %v1425_v62 }
 0x2ac   : > { %2613 = vst [vmem:[%s4915_s17 + $0xc8] sm:$0xff] %v3604_v35 }
 0x2ad   : > { %2612 = vst [vmem:[%s4915_s17 + $0xc0] sm:$0xff] %v3605_v6  ;;  %v3477_v53 = vpop.f32.mrb[26].mxu0 }
 0x2ae   : > { %v2527_v27 = vpop.f32.mrb[27].mxu0 }
 0x2b1   : > { %v3329_v5 = vpop.f32.mrb[26].mxu1  ;;  %v3480_v19 = vpop.f32.mrb[28].mxu0 }
 0x2b2   : > { %v3606_v28 = vadd.f32 %v3477_v53, %v3329_v5  ;;  %v1435_v56 = vpop.f32.mrb[27].mxu1  ;;  %v2537_v57 = vpop.f32.mrb[29].mxu0 }
 0x2b3   : > { %v3607_v39 = vadd.f32 %v2527_v27, %v1435_v56 }
 0x2b4   : > { %2615 = vst [vmem:[%s4915_s17 + $0xd8] sm:$0xff] %v3606_v28 }
 0x2b5   : > { %2614 = vst [vmem:[%s4915_s17 + $0xd0] sm:$0xff] %v3607_v39  ;;  %v3483_v22 = vpop.f32.mrb[30].mxu0 }
 0x2b6   : > { %v2547_v55 = vpop.f32.mrb[31].mxu0 }
 0x2b9   : > { %v3332_v12 = vpop.f32.mrb[28].mxu1 }
 0x2ba   : > { %v3608_v59 = vadd.f32 %v3480_v19, %v3332_v12  ;;  %v1445_v46 = vpop.f32.mrb[29].mxu1 }
 0x2bb   : > { %v3609_v14 = vadd.f32 %v2537_v57, %v1445_v46 }
 0x2bc   : > { %2617 = vst [vmem:[%s4915_s17 + $0xe8] sm:$0xff] %v3608_v59 }
 0x2bd   : > { %2616 = vst [vmem:[%s4915_s17 + $0xe0] sm:$0xff] %v3609_v14 }
 0x2c1   : > { %v3335_v17 = vpop.f32.mrb[30].mxu1 }
 0x2c2   : > { %v3610_v9 = vadd.f32 %v3483_v22, %v3335_v17  ;;  %v1455_v58 = vpop.f32.mrb[31].mxu1 }
 0x2c3   : > { %v3611_v32 = vadd.f32 %v2547_v55, %v1455_v58 }
 0x2c4   : > { %2619 = vst [vmem:[%s4915_s17 + $0xf8] sm:$0xff] %v3610_v9 }
 0x2c5   : > { %2618 = vst [vmem:[%s4915_s17 + $0xf0] sm:$0xff] %v3611_v32 }
 0x2c6   : > { %3829 = shalt.err (!%p3826_p3)
}
 0x2c7   : > { %s3830_s30 = scalar_lea.hbm %s4952_s24, 4096  ;;  %s3834_s5 = scalar_lea.hbm %s5003_s2, 8192 }
 0x2c8   : > { %p3831_p4 = scmp.ne.s32.totalorder %s4952_s24, %s3830_s30  ;;  %p3835_p9 = scmp.lt.u32.totalorder %s4952_s24, %s5003_s2 }
 0x2c9   : > { %p3836_p10 = scmp.lt.u32.totalorder %s3834_s5, %s3830_s30  ;;  %p3838_p12 = scmp.lt.u32.totalorder %s3830_s30, %s4952_s24 }
 0x2ca   : > { %p3832_p7 = pnand %p3831_p4, %p3941_p5 }
 0x2cb   : > { %p3837_p11 = por %p3836_p10, %p3835_p9 }
 0x2cc   : > { %p3833_p8 = pneg %p3832_p7 }
 0x2cd   : > { %p3839_p13 = por %p3838_p12, %p3837_p11 }
 0x2cf   : > { %p3840_p0 = pnand %p3839_p13, %p3833_p8 }
 0x2d1   : > { %3843 = shalt.err (!%p3840_p0)
}
 0x2d2   : > { %s3886_s8 = smov 128   ;;  %s3887_s14 = smov 8  }
 0x2d3   : > { %3740 = dma.vmem_to_hbm [thread:$0]  (%p3941_p5), %s4954_s22, 4096, %s4952_s24, %s4960_s26, %s3886_s8, %s3886_s8, %s3887_s14  }
 0x2d4 PF: > { %p3746_p1 = scmp.ge.s32.totalorder %s3878_s12, 2  ;;  %s2649_s16 = sand.u32 1, %s3866_s9  }
 0x2d5   : > { %s2650_s17 = scalar_lea.sflag [#allocation3], %s2649_s16 }
 0x2d6   : > { %p3743_p2 = pnand %p3746_p1, %p3945_p6 }
 0x2d8   : > { %3861 = dma.done.wait (!%p3743_p2), %s2650_s17, 4096  }
 0x2d9   : > { %3863 = vsyncadd (!%p3743_p2), %s2650_s17, 4294963200  ;;  %p12_p3 = scmp.ge.s32.totalorder %s3928_s15, 4   ;;  %s5017_s9 = smov %s3870_s10 }
 0x2da   : > { %s5018_s10 = smov %s3874_s11  ;;  %s5019_s11 = smov %s3939_s18 }
 0x2db   : > { %s5020_s12 = smov %s3928_s15  ;;  %14 = sbr.rel (!%p12_p3) target bundleno = 3 (0x3), region = 66 }
 0x2e2   :  { %2655 = vsyncpa [#allocation3], 1 }
 0x2e3   :  { %2657 = vsyncpa [#allocation3 + $0x1], 1 }

</bundles_post_ra>
